<compile_context>
chip_gen: v6e
topology: v6e:2x2x1
jax: 0.10.0
libtpu: 0.0.40
codegen_flags: <defaults>
</compile_context>

<pallas_src>
import functools
import math

import jax
import jax.numpy as jnp
from jax.experimental import pallas as pl
from jax.experimental.pallas import tpu as pltpu

_BF16 = jnp.bfloat16
_NEG_BIG = -1e10  # finite mask sentinel (matches PyTorch masked_fill(-1e10))


# ----------------------------------------------------------------------------
# VMEM budget per generation.
# ----------------------------------------------------------------------------
@functools.lru_cache(maxsize=None)
def _vmem_limit_bytes():
    try:
        cap = int(pltpu.get_tpu_info().vmem_capacity_bytes)
    except Exception:
        cap = 128 * 1024 * 1024
    # ~25% headroom for compiler scratch / double buffers; cap at 100 MiB.
    return int(min(cap * 3 // 4, 100 * 1024 * 1024))


def _stack_compiler_params():
    return pltpu.CompilerParams(
        dimension_semantics=("parallel", "arbitrary"),  # batch tiles || , layers seq
        vmem_limit_bytes=_vmem_limit_bytes(),
    )


# ----------------------------------------------------------------------------
# In-kernel helpers (traced inside the Pallas kernels).
# ----------------------------------------------------------------------------
def _layer_norm(y, g, b):
    mu = jnp.mean(y, axis=-1, keepdims=True)
    d = y - mu
    var = jnp.mean(d * d, axis=-1, keepdims=True)   # two-pass: no cancellation
    return d * jax.lax.rsqrt(var + 1e-5) * g + b


def _ffn(x, w1, b1, w2, b2):
    h = jnp.dot(x.astype(_BF16), w1, preferred_element_type=jnp.float32) + b1
    h = jnp.maximum(h, 0.0)                                             # relu
    return jnp.dot(h.astype(_BF16), w2, preferred_element_type=jnp.float32) + b2


def _mha_block(xq_bf, xkv_bf, mask, wq, bq, wk, bk, wv, bv, wo, bo,
               *, bt, sq, sk, n_heads, head_dim, attn_scale):
    """Multi-head attention for a whole batch tile.

    xq_bf: [bt*sq, H] bf16, xkv_bf: [bt*sk, H] bf16 (casts hoisted by the caller).
    mask : [bt, 1, sq|1, sk] (1 keep / 0 pad), any float dtype.
    Returns (out [bt*sq, H] f32, attn list of bt arrays [n_heads, sq, sk] f32).
    Projections use the full bt*sq / bt*sk rows (big MXU M); attention itself is
    a static per-batch-element loop with the reference's softmax-over-HEADS quirk.
    """
    hdim = n_heads * head_dim
    q = jnp.dot(xq_bf, wq, preferred_element_type=jnp.float32) + bq      # [bt*sq, H]
    k = jnp.dot(xkv_bf, wk, preferred_element_type=jnp.float32) + bk     # [bt*sk, H]
    v = jnp.dot(xkv_bf, wv, preferred_element_type=jnp.float32) + bv     # [bt*sk, H]

    qh = q.reshape(bt, sq, n_heads, head_dim).astype(_BF16)
    kh = k.reshape(bt, sk, n_heads, head_dim).astype(_BF16)
    vh = v.reshape(bt, sk, n_heads, head_dim).astype(_BF16)

    inv_scale = 1.0 / attn_scale
    ctx_rows = []
    attn_list = []
    for b in range(bt):                                   # static unroll over tile
        energy = jnp.einsum("qhd,khd->hqk", qh[b], kh[b],
                            preferred_element_type=jnp.float32) * inv_scale
        # masked_fill semantics (NOT an additive bias; see header note).
        energy = jnp.where(mask[b] == 0, _NEG_BIG, energy)

        # softmax across the HEADS axis (torch.softmax(energy, dim=1) quirk)
        m = jnp.max(energy, axis=0, keepdims=True)
        e = jnp.exp(energy - m)
        denom = jnp.sum(e, axis=0, keepdims=True)
        attn = e * pl.reciprocal(denom, approx=True)       # [h, sq, sk]

        ctx = jnp.einsum("hqk,khd->qhd", attn.astype(_BF16), vh[b],
                         preferred_element_type=jnp.float32)
        ctx_rows.append(ctx.reshape(sq, hdim))
        attn_list.append(attn)

    ctx_flat = ctx_rows[0] if bt == 1 else jnp.concatenate(ctx_rows, axis=0)
    out = jnp.dot(ctx_flat.astype(_BF16), wo, preferred_element_type=jnp.float32) + bo
    return out, attn_list


# ----------------------------------------------------------------------------
# Encoder stack kernel: grid = (B // Bt, n_layers), whole batch tile resident.
# ----------------------------------------------------------------------------
def encoder_stack_kernel(
    x_ref, mask_ref,
    wq_ref, bq_ref, wk_ref, bk_ref, wv_ref, bv_ref, wo_ref, bo_ref,
    ln1g_ref, ln1b_ref, w1_ref, b1_ref, w2_ref, b2_ref, ln2g_ref, ln2b_ref,
    out_ref,
    x_vmem,
    *, n_heads, head_dim, attn_scale,
):
    l = pl.program_id(1)
    bt, s, h = x_ref.shape

    @pl.when(l == 0)
    def _():
        x_vmem[...] = x_ref[...].reshape(bt * s, h)   # load activations once / tile

    x = x_vmem[...]                                   # [bt*s, H] f32 residual stream
    x_bf = x.astype(_BF16)                            # single hoisted cast
    mask = mask_ref[...]                              # [bt, 1, 1, s] bf16

    attn_out, _ = _mha_block(x_bf, x_bf, mask,
                             wq_ref[0], bq_ref[0], wk_ref[0], bk_ref[0],
                             wv_ref[0], bv_ref[0], wo_ref[0], bo_ref[0],
                             bt=bt, sq=s, sk=s, n_heads=n_heads,
                             head_dim=head_dim, attn_scale=attn_scale)
    x1 = _layer_norm(x + attn_out, ln1g_ref[0], ln1b_ref[0])

    ffn_out = _ffn(x1, w1_ref[0], b1_ref[0], w2_ref[0], b2_ref[0])
    x2 = _layer_norm(x1 + ffn_out, ln2g_ref[0], ln2b_ref[0])

    x_vmem[...] = x2

    @pl.when(l == pl.num_programs(1) - 1)
    def _():
        out_ref[...] = x2.reshape(bt, s, h).astype(out_ref.dtype)   # bf16 writeback


# ----------------------------------------------------------------------------
# Decoder stack kernel (no fc_out fused — hidden states + last-layer cross-attn).
# ----------------------------------------------------------------------------
def decoder_stack_kernel(
    trg_ref, enc_ref, tmask_ref, smask_ref,
    sa_wq_ref, sa_bq_ref, sa_wk_ref, sa_bk_ref, sa_wv_ref, sa_bv_ref,
    sa_wo_ref, sa_bo_ref, ln1g_ref, ln1b_ref,
    ca_wq_ref, ca_bq_ref, ca_wk_ref, ca_bk_ref, ca_wv_ref, ca_bv_ref,
    ca_wo_ref, ca_bo_ref, ln2g_ref, ln2b_ref,
    w1_ref, b1_ref, w2_ref, b2_ref, ln3g_ref, ln3b_ref,
    hid_ref, attn_ref,
    x_vmem,
    *, n_heads, head_dim, attn_scale,
):
    l = pl.program_id(1)
    bt, t, h = trg_ref.shape
    s = enc_ref.shape[1]

    @pl.when(l == 0)
    def _():
        x_vmem[...] = trg_ref[...].reshape(bt * t, h)

    x = x_vmem[...]                                   # [bt*t, H] f32
    x_bf = x.astype(_BF16)
    enc_bf = enc_ref[...].reshape(bt * s, h)          # already bf16 from encoder
    tmask = tmask_ref[...]                            # [bt, 1, t, t]
    smask = smask_ref[...]                            # [bt, 1, 1, s]

    # masked self-attention
    sa_out, _ = _mha_block(x_bf, x_bf, tmask,
                           sa_wq_ref[0], sa_bq_ref[0], sa_wk_ref[0], sa_bk_ref[0],
                           sa_wv_ref[0], sa_bv_ref[0], sa_wo_ref[0], sa_bo_ref[0],
                           bt=bt, sq=t, sk=t, n_heads=n_heads,
                           head_dim=head_dim, attn_scale=attn_scale)
    x1 = _layer_norm(x + sa_out, ln1g_ref[0], ln1b_ref[0])

    # encoder-decoder (cross) attention
    ca_out, ca_attn = _mha_block(x1.astype(_BF16), enc_bf, smask,
                                 ca_wq_ref[0], ca_bq_ref[0], ca_wk_ref[0], ca_bk_ref[0],
                                 ca_wv_ref[0], ca_bv_ref[0], ca_wo_ref[0], ca_bo_ref[0],
                                 bt=bt, sq=t, sk=s, n_heads=n_heads,
                                 head_dim=head_dim, attn_scale=attn_scale)
    x2 = _layer_norm(x1 + ca_out, ln2g_ref[0], ln2b_ref[0])

    ffn_out = _ffn(x2, w1_ref[0], b1_ref[0], w2_ref[0], b2_ref[0])
    x3 = _layer_norm(x2 + ffn_out, ln3g_ref[0], ln3b_ref[0])

    x_vmem[...] = x3

    @pl.when(l == pl.num_programs(1) - 1)
    def _():
        hid_ref[...] = x3.reshape(bt, t, h).astype(hid_ref.dtype)     # bf16 hidden
        for b in range(bt):                                           # last-layer cross-attn
            attn_ref[b] = ca_attn[b].astype(attn_ref.dtype)


# ----------------------------------------------------------------------------
# fc_out: separate pallas_call, tiled over rows and vocab (lane-dense stores).
# ----------------------------------------------------------------------------
def fc_out_kernel(x_ref, w_ref, b_ref, o_ref):
    o_ref[...] = (jnp.dot(x_ref[...], w_ref[...],
                          preferred_element_type=jnp.float32)
                  + b_ref[...]).astype(o_ref.dtype)


def _pick_tile(n, candidates=(512, 256, 128)):
    for c in candidates:
        if n % c == 0:
            return c
    return n   # fall back to the full extent (always legal as a block dim)


def fc_out_forward(x, fc_w, fc_b):
    m, h = x.shape
    v = fc_w.shape[1]
    tm = _pick_tile(m)
    tv = _pick_tile(v)
    return pl.pallas_call(
        fc_out_kernel,
        out_shape=jax.ShapeDtypeStruct((m, v), jnp.float32),
        grid_spec=pltpu.PrefetchScalarGridSpec(
            num_scalar_prefetch=0,
            grid=(m // tm, v // tv),
            in_specs=[pl.BlockSpec((tm, h), lambda i, j: (i, 0)),
                      pl.BlockSpec((h, tv), lambda i, j: (0, j)),
                      pl.BlockSpec((1, tv), lambda i, j: (0, j))],
            out_specs=pl.BlockSpec((tm, tv), lambda i, j: (i, j)),
        ),
        compiler_params=pltpu.CompilerParams(
            dimension_semantics=("parallel", "parallel"),
            vmem_limit_bytes=_vmem_limit_bytes()),
    )(x, fc_w, fc_b)


# ----------------------------------------------------------------------------
# BlockSpec helpers and stack wrappers.
# ----------------------------------------------------------------------------
_ENC_WEIGHTS = ("wq", "bq", "wk", "bk", "wv", "bv", "wo", "bo",
                "ln1_g", "ln1_b", "w1", "b1", "w2", "b2", "ln2_g", "ln2_b")

_DEC_WEIGHTS = ("sa_wq", "sa_bq", "sa_wk", "sa_bk", "sa_wv", "sa_bv", "sa_wo", "sa_bo",
                "ln1_g", "ln1_b",
                "ca_wq", "ca_bq", "ca_wk", "ca_bk", "ca_wv", "ca_bv", "ca_wo", "ca_bo",
                "ln2_g", "ln2_b",
                "w1", "b1", "w2", "b2", "ln3_g", "ln3_b")


def _layer_weight_spec(w):
    # stacked per-layer weight [L, a, b]: one layer per block, indexed by layer axis;
    # block index is independent of the batch-tile axis -> streamed once per tile.
    return pl.BlockSpec((1,) + w.shape[1:], lambda i, l: (l, 0, 0))


def _batch_spec(a, bt):
    # per-batch-tile activation / mask [B, ...]: indexed by the batch-tile axis,
    # constant across layers (fetched once per tile, never re-DMA'd per layer).
    nd = a.ndim
    return pl.BlockSpec((bt,) + a.shape[1:], lambda i, l: (i,) + (0,) * (nd - 1))


def encoder_forward(src, src_mask, p, n_heads, batch_tile=None):
    B, S = src.shape
    H = p["tok_emb"].shape[1]
    L = p["wq"].shape[0]
    head_dim = H // n_heads
    Bt = B if batch_tile is None else batch_tile
    assert B % Bt == 0

    pos = jnp.arange(S)[None, :]
    x = (p["tok_emb"][src] * math.sqrt(H) + p["pos_emb"][pos]).astype(jnp.float32)

    weights = [p[name] for name in _ENC_WEIGHTS]
    kernel = functools.partial(encoder_stack_kernel, n_heads=n_heads,
                               head_dim=head_dim, attn_scale=math.sqrt(head_dim))

    return pl.pallas_call(
        kernel,
        out_shape=jax.ShapeDtypeStruct((B, S, H), _BF16),   # enc_src streamed bf16
        grid_spec=pltpu.PrefetchScalarGridSpec(
            num_scalar_prefetch=0,
            grid=(B // Bt, L),
            in_specs=[_batch_spec(x, Bt), _batch_spec(src_mask, Bt)]
                     + [_layer_weight_spec(w) for w in weights],
            out_specs=pl.BlockSpec((Bt, S, H), lambda i, l: (i, 0, 0)),
            scratch_shapes=[pltpu.VMEM((Bt * S, H), jnp.float32)],
        ),
        compiler_params=_stack_compiler_params(),
    )(x, src_mask, *weights)


def decoder_forward(trg, enc_src, trg_mask, src_mask, p, n_heads, batch_tile=None):
    B, T = trg.shape
    S = enc_src.shape[1]
    H = p["tok_emb"].shape[1]
    L = p["sa_wq"].shape[0]
    V = p["fc_w"].shape[1]
    head_dim = H // n_heads
    Bt = B if batch_tile is None else batch_tile
    assert B % Bt == 0

    pos = jnp.arange(T)[None, :]
    x = (p["tok_emb"][trg] * math.sqrt(H) + p["pos_emb"][pos]).astype(jnp.float32)

    weights = [p[name] for name in _DEC_WEIGHTS]
    kernel = functools.partial(decoder_stack_kernel, n_heads=n_heads,
                               head_dim=head_dim, attn_scale=math.sqrt(head_dim))

    hid, attn = pl.pallas_call(
        kernel,
        out_shape=(jax.ShapeDtypeStruct((B, T, H), _BF16),            # hidden -> fc_out
                   jax.ShapeDtypeStruct((B, n_heads, T, S), _BF16)),  # cross-attention
        grid_spec=pltpu.PrefetchScalarGridSpec(
            num_scalar_prefetch=0,
            grid=(B // Bt, L),
            in_specs=[_batch_spec(x, Bt), _batch_spec(enc_src, Bt),
                      _batch_spec(trg_mask, Bt), _batch_spec(src_mask, Bt)]
                     + [_layer_weight_spec(w) for w in weights],
            out_specs=(pl.BlockSpec((Bt, T, H), lambda i, l: (i, 0, 0)),
                       pl.BlockSpec((Bt, n_heads, T, S), lambda i, l: (i, 0, 0, 0))),
            scratch_shapes=[pltpu.VMEM((Bt * T, H), jnp.float32)],
        ),
        compiler_params=_stack_compiler_params(),
    )(x, enc_src, trg_mask, src_mask, *weights)

    # vocab projection in its own tiled kernel (review: un-fuse fc_out)
    logits = fc_out_forward(hid.reshape(B * T, H), p["fc_w"], p["fc_b"])
    return logits.reshape(B, T, V), attn.astype(jnp.float32)


# ----------------------------------------------------------------------------
# Transformer forward: masks (plain JAX) + encoder + decoder.
# ----------------------------------------------------------------------------
def make_src_mask(src, src_pad_idx):
    # (src != pad).unsqueeze(1).unsqueeze(2) -> [B, 1, 1, S]; 1 keep / 0 pad; bf16
    return (src != src_pad_idx).astype(_BF16)[:, None, None, :]


def make_trg_mask(trg, trg_pad_idx):
    T = trg.shape[1]
    pad = (trg != trg_pad_idx)[:, None, None, :]               # [B, 1, 1, T]
    causal = jnp.tril(jnp.ones((T, T), dtype=bool))            # [T, T]
    return (pad & causal[None, None]).astype(_BF16)            # [B, 1, T, T]


def transformer_forward(src, trg, params, n_heads, src_pad_idx, trg_pad_idx,
                        batch_tile=None):
    # batch_tile: batch elements processed per grid step (weights streamed once per
    # tile).  Default = full batch; on v7x set batch_tile = B // 2 to use both TCs.
    src_mask = make_src_mask(src, src_pad_idx)
    trg_mask = make_trg_mask(trg, trg_pad_idx)
    enc_src = encoder_forward(src, src_mask, params["encoder"], n_heads, batch_tile)
    output, attention = decoder_forward(trg, enc_src, trg_mask, src_mask,
                                        params["decoder"], n_heads, batch_tile)
    return output, attention


# ----------------------------------------------------------------------------
# Deterministic synthetic parameters (no checkpoint loading).
# Matmul weights stored as bf16; biases/LN/embeddings f32.
# ----------------------------------------------------------------------------
def init_params(key, input_dim, output_dim, hid_dim, n_layers, pf_dim, max_length):
    key_box = [key]

    def nk():
        key_box[0], sub = jax.random.split(key_box[0])
        return sub

    def rnd(shape, dtype=jnp.float32, scale=0.1):
        return (jax.random.normal(nk(), shape, dtype=jnp.float32) * scale).astype(dtype)

    def ones(shape):
        return jnp.ones(shape, jnp.float32)

    def zeros(shape):
        return jnp.zeros(shape, jnp.float32)

    L, H, P = n_layers, hid_dim, pf_dim
    bf = _BF16

    encoder = {
        "tok_emb": rnd((input_dim, H)),
        "pos_emb": rnd((max_length, H)),
        "wq": rnd((L, H, H), bf), "bq": rnd((L, 1, H)),
        "wk": rnd((L, H, H), bf), "bk": rnd((L, 1, H)),
        "wv": rnd((L, H, H), bf), "bv": rnd((L, 1, H)),
        "wo": rnd((L, H, H), bf), "bo": rnd((L, 1, H)),
        "ln1_g": ones((L, 1, H)), "ln1_b": zeros((L, 1, H)),
        "w1": rnd((L, H, P), bf), "b1": rnd((L, 1, P)),
        "w2": rnd((L, P, H), bf), "b2": rnd((L, 1, H)),
        "ln2_g": ones((L, 1, H)), "ln2_b": zeros((L, 1, H)),
    }
    decoder = {
        "tok_emb": rnd((output_dim, H)),
        "pos_emb": rnd((max_length, H)),
        "sa_wq": rnd((L, H, H), bf), "sa_bq": rnd((L, 1, H)),
        "sa_wk": rnd((L, H, H), bf), "sa_bk": rnd((L, 1, H)),
        "sa_wv": rnd((L, H, H), bf), "sa_bv": rnd((L, 1, H)),
        "sa_wo": rnd((L, H, H), bf), "sa_bo": rnd((L, 1, H)),
        "ln1_g": ones((L, 1, H)), "ln1_b": zeros((L, 1, H)),
        "ca_wq": rnd((L, H, H), bf), "ca_bq": rnd((L, 1, H)),
        "ca_wk": rnd((L, H, H), bf), "ca_bk": rnd((L, 1, H)),
        "ca_wv": rnd((L, H, H), bf), "ca_bv": rnd((L, 1, H)),
        "ca_wo": rnd((L, H, H), bf), "ca_bo": rnd((L, 1, H)),
        "ln2_g": ones((L, 1, H)), "ln2_b": zeros((L, 1, H)),
        "w1": rnd((L, H, P), bf), "b1": rnd((L, 1, P)),
        "w2": rnd((L, P, H), bf), "b2": rnd((L, 1, H)),
        "ln3_g": ones((L, 1, H)), "ln3_b": zeros((L, 1, H)),
        "fc_w": rnd((H, output_dim), bf), "fc_b": rnd((1, output_dim)),
    }
    return {"encoder": encoder, "decoder": decoder}


if __name__ == "__main__":
    B, S_SRC, T_TRG = 2, 8, 8
    INPUT_DIM, OUTPUT_DIM = 50, 50
    HID_DIM, N_LAYERS, N_HEADS, PF_DIM, MAX_LEN = 32, 2, 4, 64, 100
    SRC_PAD_IDX = 0
    TRG_PAD_IDX = 0

    root = jax.random.PRNGKey(0)
    k_param, k_src, k_trg = jax.random.split(root, 3)

    params = init_params(k_param, INPUT_DIM, OUTPUT_DIM, HID_DIM, N_LAYERS,
                         PF_DIM, MAX_LEN)
    src = jax.random.randint(k_src, (B, S_SRC), 0, INPUT_DIM, dtype=jnp.int32)
    trg = jax.random.randint(k_trg, (B, T_TRG), 0, OUTPUT_DIM, dtype=jnp.int32)

    output, attention = transformer_forward(src, trg, params, N_HEADS,
                                            SRC_PAD_IDX, TRG_PAD_IDX)
    output = jax.block_until_ready(output)
    attention = jax.block_until_ready(attention)

    assert output.shape == (B, T_TRG, OUTPUT_DIM)
    assert attention.shape == (B, N_HEADS, T_TRG, S_SRC)
    assert bool(jnp.all(jnp.isfinite(output)))
    assert bool(jnp.all(jnp.isfinite(attention)))
    print("KERNEL_OK")
</pallas_src>

<mosaic_0001>
module attributes {stable_mosaic.version = 11 : i64} {
  func.func @encoder_stack_kernel(%arg0: i32, %arg1: i32, %arg2: memref<2x8x32xf32, #tpu.memory_space<vmem>>, %arg3: memref<2x1x1x8xbf16, #tpu.memory_space<vmem>>, %arg4: memref<1x32x32xbf16, #tpu.memory_space<vmem>>, %arg5: memref<1x1x32xf32, #tpu.memory_space<vmem>>, %arg6: memref<1x32x32xbf16, #tpu.memory_space<vmem>>, %arg7: memref<1x1x32xf32, #tpu.memory_space<vmem>>, %arg8: memref<1x32x32xbf16, #tpu.memory_space<vmem>>, %arg9: memref<1x1x32xf32, #tpu.memory_space<vmem>>, %arg10: memref<1x32x32xbf16, #tpu.memory_space<vmem>>, %arg11: memref<1x1x32xf32, #tpu.memory_space<vmem>>, %arg12: memref<1x1x32xf32, #tpu.memory_space<vmem>>, %arg13: memref<1x1x32xf32, #tpu.memory_space<vmem>>, %arg14: memref<1x32x64xbf16, #tpu.memory_space<vmem>>, %arg15: memref<1x1x64xf32, #tpu.memory_space<vmem>>, %arg16: memref<1x64x32xbf16, #tpu.memory_space<vmem>>, %arg17: memref<1x1x32xf32, #tpu.memory_space<vmem>>, %arg18: memref<1x1x32xf32, #tpu.memory_space<vmem>>, %arg19: memref<1x1x32xf32, #tpu.memory_space<vmem>>, %arg20: memref<2x8x32xbf16, #tpu.memory_space<vmem>>, %arg21: memref<16x32xf32, #tpu.memory_space<vmem>>) attributes {dimension_semantics = [#tpu.dimension_semantics<parallel>, #tpu.dimension_semantics<arbitrary>], iteration_bounds = array<i64: 1, 2>, scalar_prefetch = 0 : i64, scratch_operands = 1 : i64, tpu.core_type = #tpu.core_type<tc>, window_params = [{transform_indices = @transform_0, window_bounds = array<i64: 2, 8, 32>}, {transform_indices = @transform_1, window_bounds = array<i64: 2, 1, 1, 8>}, {transform_indices = @transform_2, window_bounds = array<i64: 1, 32, 32>}, {transform_indices = @transform_3, window_bounds = array<i64: 1, 1, 32>}, {transform_indices = @transform_4, window_bounds = array<i64: 1, 32, 32>}, {transform_indices = @transform_5, window_bounds = array<i64: 1, 1, 32>}, {transform_indices = @transform_6, window_bounds = array<i64: 1, 32, 32>}, {transform_indices = @transform_7, window_bounds = array<i64: 1, 1, 32>}, {transform_indices = @transform_8, window_bounds = array<i64: 1, 32, 32>}, {transform_indices = @transform_9, window_bounds = array<i64: 1, 1, 32>}, {transform_indices = @transform_10, window_bounds = array<i64: 1, 1, 32>}, {transform_indices = @transform_11, window_bounds = array<i64: 1, 1, 32>}, {transform_indices = @transform_12, window_bounds = array<i64: 1, 32, 64>}, {transform_indices = @transform_13, window_bounds = array<i64: 1, 1, 64>}, {transform_indices = @transform_14, window_bounds = array<i64: 1, 64, 32>}, {transform_indices = @transform_15, window_bounds = array<i64: 1, 1, 32>}, {transform_indices = @transform_16, window_bounds = array<i64: 1, 1, 32>}, {transform_indices = @transform_17, window_bounds = array<i64: 1, 1, 32>}, {transform_indices = @transform_18, window_bounds = array<i64: 2, 8, 32>}]} {
    %c0_i32 = arith.constant 0 : i32
    %0 = arith.cmpi eq, %arg1, %c0_i32 : i32
    %1 = arith.extui %0 : i1 to i32
    %c0_i32_0 = arith.constant 0 : i32
    %2 = arith.cmpi ne, %1, %c0_i32_0 : i32
    scf.if %2 {
      %c0_87 = arith.constant 0 : index
      %c0_88 = arith.constant 0 : index
      %c0_89 = arith.constant 0 : index
      %176 = vector.load %arg2[%c0_87, %c0_88, %c0_89] : memref<2x8x32xf32, #tpu.memory_space<vmem>>, vector<2x8x32xf32>
      %177 = vector.shape_cast %176 : vector<2x8x32xf32> to vector<16x32xf32>
      %c0_90 = arith.constant 0 : index
      %c0_91 = arith.constant 0 : index
      %178 = vector.load %arg21[%c0_90, %c0_91] : memref<16x32xf32, #tpu.memory_space<vmem>>, vector<16x32xf32>
      tpu.vector_store %arg21[%c0_90, %c0_91], %177 {strides = array<i32>} : memref<16x32xf32, #tpu.memory_space<vmem>>, vector<16x32xf32>,
    } else {
    }
    %c0 = arith.constant 0 : index
    %c0_1 = arith.constant 0 : index
    %3 = vector.load %arg21[%c0, %c0_1] : memref<16x32xf32, #tpu.memory_space<vmem>>, vector<16x32xf32>
    %4 = arith.truncf %3 : vector<16x32xf32> to vector<16x32xbf16>
    %c0_2 = arith.constant 0 : index
    %c0_3 = arith.constant 0 : index
    %c0_4 = arith.constant 0 : index
    %c0_5 = arith.constant 0 : index
    %5 = vector.load %arg3[%c0_2, %c0_3, %c0_4, %c0_5] : memref<2x1x1x8xbf16, #tpu.memory_space<vmem>>, vector<2x1x1x8xbf16>
    %c0_6 = arith.constant 0 : index
    %c0_7 = arith.constant 0 : index
    %c0_8 = arith.constant 0 : index
    %6 = vector.load %arg4[%c0_6, %c0_7, %c0_8] : memref<1x32x32xbf16, #tpu.memory_space<vmem>>, vector<1x32x32xbf16>
    %7 = vector.shape_cast %6 : vector<1x32x32xbf16> to vector<32x32xbf16>
    %c0_9 = arith.constant 0 : index
    %c0_10 = arith.constant 0 : index
    %c0_11 = arith.constant 0 : index
    %8 = vector.load %arg5[%c0_9, %c0_10, %c0_11] : memref<1x1x32xf32, #tpu.memory_space<vmem>>, vector<1x1x32xf32>
    %9 = vector.shape_cast %8 : vector<1x1x32xf32> to vector<1x32xf32>
    %c0_12 = arith.constant 0 : index
    %c0_13 = arith.constant 0 : index
    %c0_14 = arith.constant 0 : index
    %10 = vector.load %arg6[%c0_12, %c0_13, %c0_14] : memref<1x32x32xbf16, #tpu.memory_space<vmem>>, vector<1x32x32xbf16>
    %11 = vector.shape_cast %10 : vector<1x32x32xbf16> to vector<32x32xbf16>
    %c0_15 = arith.constant 0 : index
    %c0_16 = arith.constant 0 : index
    %c0_17 = arith.constant 0 : index
    %12 = vector.load %arg7[%c0_15, %c0_16, %c0_17] : memref<1x1x32xf32, #tpu.memory_space<vmem>>, vector<1x1x32xf32>
    %13 = vector.shape_cast %12 : vector<1x1x32xf32> to vector<1x32xf32>
    %c0_18 = arith.constant 0 : index
    %c0_19 = arith.constant 0 : index
    %c0_20 = arith.constant 0 : index
    %14 = vector.load %arg8[%c0_18, %c0_19, %c0_20] : memref<1x32x32xbf16, #tpu.memory_space<vmem>>, vector<1x32x32xbf16>
    %15 = vector.shape_cast %14 : vector<1x32x32xbf16> to vector<32x32xbf16>
    %c0_21 = arith.constant 0 : index
    %c0_22 = arith.constant 0 : index
    %c0_23 = arith.constant 0 : index
    %16 = vector.load %arg9[%c0_21, %c0_22, %c0_23] : memref<1x1x32xf32, #tpu.memory_space<vmem>>, vector<1x1x32xf32>
    %17 = vector.shape_cast %16 : vector<1x1x32xf32> to vector<1x32xf32>
    %c0_24 = arith.constant 0 : index
    %c0_25 = arith.constant 0 : index
    %c0_26 = arith.constant 0 : index
    %18 = vector.load %arg10[%c0_24, %c0_25, %c0_26] : memref<1x32x32xbf16, #tpu.memory_space<vmem>>, vector<1x32x32xbf16>
    %19 = vector.shape_cast %18 : vector<1x32x32xbf16> to vector<32x32xbf16>
    %c0_27 = arith.constant 0 : index
    %c0_28 = arith.constant 0 : index
    %c0_29 = arith.constant 0 : index
    %20 = vector.load %arg11[%c0_27, %c0_28, %c0_29] : memref<1x1x32xf32, #tpu.memory_space<vmem>>, vector<1x1x32xf32>
    %21 = vector.shape_cast %20 : vector<1x1x32xf32> to vector<1x32xf32>
    %cst = arith.constant dense<0.000000e+00> : vector<16x32xf32>
    %22 = tpu.matmul %4, %7, %cst {dimension_numbers = #tpu.dot_dimension_numbers<[1], [0], [0], [1], [0, 0, 1, 1], [], []>} : vector<16x32xbf16>, vector<32x32xbf16>, vector<16x32xf32> -> vector<16x32xf32>
    %23 = vector.broadcast %9 : vector<1x32xf32> to vector<16x32xf32>
    %24 = arith.addf %22, %23 : vector<16x32xf32>
    %cst_30 = arith.constant dense<0.000000e+00> : vector<16x32xf32>
    %25 = tpu.matmul %4, %11, %cst_30 {dimension_numbers = #tpu.dot_dimension_numbers<[1], [0], [0], [1], [0, 0, 1, 1], [], []>} : vector<16x32xbf16>, vector<32x32xbf16>, vector<16x32xf32> -> vector<16x32xf32>
    %26 = vector.broadcast %13 : vector<1x32xf32> to vector<16x32xf32>
    %27 = arith.addf %25, %26 : vector<16x32xf32>
    %cst_31 = arith.constant dense<0.000000e+00> : vector<16x32xf32>
    %28 = tpu.matmul %4, %15, %cst_31 {dimension_numbers = #tpu.dot_dimension_numbers<[1], [0], [0], [1], [0, 0, 1, 1], [], []>} : vector<16x32xbf16>, vector<32x32xbf16>, vector<16x32xf32> -> vector<16x32xf32>
    %29 = vector.broadcast %17 : vector<1x32xf32> to vector<16x32xf32>
    %30 = arith.addf %28, %29 : vector<16x32xf32>
    %31 = vector.shape_cast %24 : vector<16x32xf32> to vector<2x8x4x8xf32>
    %32 = arith.truncf %31 : vector<2x8x4x8xf32> to vector<2x8x4x8xbf16>
    %33 = vector.shape_cast %27 : vector<16x32xf32> to vector<2x8x4x8xf32>
    %34 = arith.truncf %33 : vector<2x8x4x8xf32> to vector<2x8x4x8xbf16>
    %35 = vector.shape_cast %30 : vector<16x32xf32> to vector<2x8x4x8xf32>
    %36 = arith.truncf %35 : vector<2x8x4x8xf32> to vector<2x8x4x8xbf16>
    %37 = vector.extract_strided_slice %32 {offsets = [0, 0, 0, 0], sizes = [1, 8, 4, 8], strides = [1, 1, 1, 1]} : vector<2x8x4x8xbf16> to vector<1x8x4x8xbf16>
    %38 = vector.shape_cast %37 : vector<1x8x4x8xbf16> to vector<8x4x8xbf16>
    %39 = vector.extract_strided_slice %34 {offsets = [0, 0, 0, 0], sizes = [1, 8, 4, 8], strides = [1, 1, 1, 1]} : vector<2x8x4x8xbf16> to vector<1x8x4x8xbf16>
    %40 = vector.shape_cast %39 : vector<1x8x4x8xbf16> to vector<8x4x8xbf16>
    "tpu.trace_start"() <{level = 10 : i32, message = "qhd,khd->hqk"}> : () -> ()
    %cst_32 = arith.constant dense<0.000000e+00> : vector<4x8x8xf32>
    %41 = tpu.matmul %38, %40, %cst_32 {dimension_numbers = #tpu.dot_dimension_numbers<[2], [2], [0], [0], [0, 1, 0, 0, 1, 0], [1], [1]>} : vector<8x4x8xbf16>, vector<8x4x8xbf16>, vector<4x8x8xf32> -> vector<4x8x8xf32>
    "tpu.trace_stop"() : () -> ()
    %cst_33 = arith.constant 0.353553385 : f32
    %42 = vector.broadcast %cst_33 : f32 to vector<4x8x8xf32>
    %43 = arith.mulf %41, %42 : vector<4x8x8xf32>
    %44 = vector.extract_strided_slice %5 {offsets = [0, 0, 0, 0], sizes = [1, 1, 1, 8], strides = [1, 1, 1, 1]} : vector<2x1x1x8xbf16> to vector<1x1x1x8xbf16>
    %45 = vector.shape_cast %44 : vector<1x1x1x8xbf16> to vector<1x1x8xbf16>
    %cst_34 = arith.constant 0.000000e+00 : bf16
    %46 = vector.broadcast %cst_34 : bf16 to vector<1x1x8xbf16>
    %47 = arith.cmpf oeq, %45, %46 : vector<1x1x8xbf16>
    %cst_35 = arith.constant -1.000000e+10 : f32
    %48 = vector.shape_cast %47 : vector<1x1x8xi1> to vector<1x1x8xi1>
    %49 = vector.broadcast %48 : vector<1x1x8xi1> to vector<4x8x8xi1>
    %50 = vector.broadcast %cst_35 : f32 to vector<4x8x8xf32>
    %51 = arith.select %49, %50, %43 : vector<4x8x8xi1>, vector<4x8x8xf32>
    %cst_36 = arith.constant dense<0xFF800000> : vector<8x8xf32>
    %52 = vector.multi_reduction <maximumf>, %51, %cst_36 [0] : vector<4x8x8xf32> to vector<8x8xf32>
    %53 = vector.shape_cast %52 : vector<8x8xf32> to vector<1x8x8xf32>
    %54 = vector.broadcast %53 : vector<1x8x8xf32> to vector<4x8x8xf32>
    %55 = arith.subf %51, %54 : vector<4x8x8xf32>
    %56 = math.exp %55 : vector<4x8x8xf32>
    %cst_37 = arith.constant dense<0.000000e+00> : vector<8x8xf32>
    %57 = vector.multi_reduction <add>, %56, %cst_37 [0] : vector<4x8x8xf32> to vector<8x8xf32>
    %58 = vector.shape_cast %57 : vector<8x8xf32> to vector<1x8x8xf32>
    %59 = tpu.reciprocal %58 {approx = true} : vector<1x8x8xf32> -> vector<1x8x8xf32>
    %60 = vector.broadcast %59 : vector<1x8x8xf32> to vector<4x8x8xf32>
    %61 = arith.mulf %56, %60 : vector<4x8x8xf32>
    %62 = arith.truncf %61 : vector<4x8x8xf32> to vector<4x8x8xbf16>
    %63 = vector.extract_strided_slice %36 {offsets = [0, 0, 0, 0], sizes = [1, 8, 4, 8], strides = [1, 1, 1, 1]} : vector<2x8x4x8xbf16> to vector<1x8x4x8xbf16>
    %64 = vector.shape_cast %63 : vector<1x8x4x8xbf16> to vector<8x4x8xbf16>
    "tpu.trace_start"() <{level = 10 : i32, message = "hqk,khd->qhd"}> : () -> ()
    %cst_38 = arith.constant dense<0.000000e+00> : vector<4x8x8xf32>
    %65 = tpu.matmul %64, %62, %cst_38 {dimension_numbers = #tpu.dot_dimension_numbers<[0], [2], [2], [1], [0, 1, 0, 2, 1, 1], [1], [0]>} : vector<8x4x8xbf16>, vector<4x8x8xbf16>, vector<4x8x8xf32> -> vector<4x8x8xf32>
    %66 = tpu.transpose %65, [2, 0, 1] : vector<4x8x8xf32> -> vector<8x4x8xf32>
    "tpu.trace_stop"() : () -> ()
    %67 = vector.shape_cast %66 : vector<8x4x8xf32> to vector<8x32xf32>
    %68 = vector.extract_strided_slice %32 {offsets = [1, 0, 0, 0], sizes = [1, 8, 4, 8], strides = [1, 1, 1, 1]} : vector<2x8x4x8xbf16> to vector<1x8x4x8xbf16>
    %69 = vector.shape_cast %68 : vector<1x8x4x8xbf16> to vector<8x4x8xbf16>
    %70 = vector.extract_strided_slice %34 {offsets = [1, 0, 0, 0], sizes = [1, 8, 4, 8], strides = [1, 1, 1, 1]} : vector<2x8x4x8xbf16> to vector<1x8x4x8xbf16>
    %71 = vector.shape_cast %70 : vector<1x8x4x8xbf16> to vector<8x4x8xbf16>
    "tpu.trace_start"() <{level = 10 : i32, message = "qhd,khd->hqk"}> : () -> ()
    %cst_39 = arith.constant dense<0.000000e+00> : vector<4x8x8xf32>
    %72 = tpu.matmul %69, %71, %cst_39 {dimension_numbers = #tpu.dot_dimension_numbers<[2], [2], [0], [0], [0, 1, 0, 0, 1, 0], [1], [1]>} : vector<8x4x8xbf16>, vector<8x4x8xbf16>, vector<4x8x8xf32> -> vector<4x8x8xf32>
    "tpu.trace_stop"() : () -> ()
    %cst_40 = arith.constant 0.353553385 : f32
    %73 = vector.broadcast %cst_40 : f32 to vector<4x8x8xf32>
    %74 = arith.mulf %72, %73 : vector<4x8x8xf32>
    %75 = vector.extract_strided_slice %5 {offsets = [1, 0, 0, 0], sizes = [1, 1, 1, 8], strides = [1, 1, 1, 1]} : vector<2x1x1x8xbf16> to vector<1x1x1x8xbf16>
    %76 = vector.shape_cast %75 : vector<1x1x1x8xbf16> to vector<1x1x8xbf16>
    %cst_41 = arith.constant 0.000000e+00 : bf16
    %77 = vector.broadcast %cst_41 : bf16 to vector<1x1x8xbf16>
    %78 = arith.cmpf oeq, %76, %77 : vector<1x1x8xbf16>
    %cst_42 = arith.constant -1.000000e+10 : f32
    %79 = vector.shape_cast %78 : vector<1x1x8xi1> to vector<1x1x8xi1>
    %80 = vector.broadcast %79 : vector<1x1x8xi1> to vector<4x8x8xi1>
    %81 = vector.broadcast %cst_42 : f32 to vector<4x8x8xf32>
    %82 = arith.select %80, %81, %74 : vector<4x8x8xi1>, vector<4x8x8xf32>
    %cst_43 = arith.constant dense<0xFF800000> : vector<8x8xf32>
    %83 = vector.multi_reduction <maximumf>, %82, %cst_43 [0] : vector<4x8x8xf32> to vector<8x8xf32>
    %84 = vector.shape_cast %83 : vector<8x8xf32> to vector<1x8x8xf32>
    %85 = vector.broadcast %84 : vector<1x8x8xf32> to vector<4x8x8xf32>
    %86 = arith.subf %82, %85 : vector<4x8x8xf32>
    %87 = math.exp %86 : vector<4x8x8xf32>
    %cst_44 = arith.constant dense<0.000000e+00> : vector<8x8xf32>
    %88 = vector.multi_reduction <add>, %87, %cst_44 [0] : vector<4x8x8xf32> to vector<8x8xf32>
    %89 = vector.shape_cast %88 : vector<8x8xf32> to vector<1x8x8xf32>
    %90 = tpu.reciprocal %89 {approx = true} : vector<1x8x8xf32> -> vector<1x8x8xf32>
    %91 = vector.broadcast %90 : vector<1x8x8xf32> to vector<4x8x8xf32>
    %92 = arith.mulf %87, %91 : vector<4x8x8xf32>
    %93 = arith.truncf %92 : vector<4x8x8xf32> to vector<4x8x8xbf16>
    %94 = vector.extract_strided_slice %36 {offsets = [1, 0, 0, 0], sizes = [1, 8, 4, 8], strides = [1, 1, 1, 1]} : vector<2x8x4x8xbf16> to vector<1x8x4x8xbf16>
    %95 = vector.shape_cast %94 : vector<1x8x4x8xbf16> to vector<8x4x8xbf16>
    "tpu.trace_start"() <{level = 10 : i32, message = "hqk,khd->qhd"}> : () -> ()
    %cst_45 = arith.constant dense<0.000000e+00> : vector<4x8x8xf32>
    %96 = tpu.matmul %95, %93, %cst_45 {dimension_numbers = #tpu.dot_dimension_numbers<[0], [2], [2], [1], [0, 1, 0, 2, 1, 1], [1], [0]>} : vector<8x4x8xbf16>, vector<4x8x8xbf16>, vector<4x8x8xf32> -> vector<4x8x8xf32>
    %97 = tpu.transpose %96, [2, 0, 1] : vector<4x8x8xf32> -> vector<8x4x8xf32>
    "tpu.trace_stop"() : () -> ()
    %98 = vector.shape_cast %97 : vector<8x4x8xf32> to vector<8x32xf32>
    %99 = tpu.concatenate %67, %98 in 0 : vector<8x32xf32>, vector<8x32xf32> -> vector<16x32xf32>
    %100 = arith.truncf %99 : vector<16x32xf32> to vector<16x32xbf16>
    %cst_46 = arith.constant dense<0.000000e+00> : vector<16x32xf32>
    %101 = tpu.matmul %100, %19, %cst_46 {dimension_numbers = #tpu.dot_dimension_numbers<[1], [0], [0], [1], [0, 0, 1, 1], [], []>} : vector<16x32xbf16>, vector<32x32xbf16>, vector<16x32xf32> -> vector<16x32xf32>
    %102 = vector.broadcast %21 : vector<1x32xf32> to vector<16x32xf32>
    %103 = arith.addf %101, %102 : vector<16x32xf32>
    %104 = arith.addf %3, %103 : vector<16x32xf32>
    %c0_47 = arith.constant 0 : index
    %c0_48 = arith.constant 0 : index
    %c0_49 = arith.constant 0 : index
    %105 = vector.load %arg12[%c0_47, %c0_48, %c0_49] : memref<1x1x32xf32, #tpu.memory_space<vmem>>, vector<1x1x32xf32>
    %106 = vector.shape_cast %105 : vector<1x1x32xf32> to vector<1x32xf32>
    %c0_50 = arith.constant 0 : index
    %c0_51 = arith.constant 0 : index
    %c0_52 = arith.constant 0 : index
    %107 = vector.load %arg13[%c0_50, %c0_51, %c0_52] : memref<1x1x32xf32, #tpu.memory_space<vmem>>, vector<1x1x32xf32>
    %108 = vector.shape_cast %107 : vector<1x1x32xf32> to vector<1x32xf32>
    %cst_53 = arith.constant dense<0.000000e+00> : vector<16xf32>
    %109 = vector.multi_reduction <add>, %104, %cst_53 [1] : vector<16x32xf32> to vector<16xf32>
    %110 = vector.shape_cast %109 : vector<16xf32> to vector<16x1xf32>
    %cst_54 = arith.constant 3.200000e+01 : f32
    %111 = vector.broadcast %cst_54 : f32 to vector<16x1xf32>
    %112 = arith.divf %110, %111 : vector<16x1xf32>
    %113 = vector.broadcast %112 : vector<16x1xf32> to vector<16x32xf32>
    %114 = arith.subf %104, %113 : vector<16x32xf32>
    %115 = arith.mulf %114, %114 : vector<16x32xf32>
    %cst_55 = arith.constant dense<0.000000e+00> : vector<16xf32>
    %116 = vector.multi_reduction <add>, %115, %cst_55 [1] : vector<16x32xf32> to vector<16xf32>
    %117 = vector.shape_cast %116 : vector<16xf32> to vector<16x1xf32>
    %cst_56 = arith.constant 3.200000e+01 : f32
    %118 = vector.broadcast %cst_56 : f32 to vector<16x1xf32>
    %119 = arith.divf %117, %118 : vector<16x1xf32>
    %cst_57 = arith.constant 9.99999974E-6 : f32
    %120 = vector.broadcast %cst_57 : f32 to vector<16x1xf32>
    %121 = arith.addf %119, %120 : vector<16x1xf32>
    %122 = math.rsqrt %121 : vector<16x1xf32>
    %123 = vector.broadcast %122 : vector<16x1xf32> to vector<16x32xf32>
    %124 = arith.mulf %114, %123 : vector<16x32xf32>
    %125 = vector.broadcast %106 : vector<1x32xf32> to vector<16x32xf32>
    %126 = arith.mulf %124, %125 : vector<16x32xf32>
    %127 = vector.broadcast %108 : vector<1x32xf32> to vector<16x32xf32>
    %128 = arith.addf %126, %127 : vector<16x32xf32>
    %c0_58 = arith.constant 0 : index
    %c0_59 = arith.constant 0 : index
    %c0_60 = arith.constant 0 : index
    %129 = vector.load %arg14[%c0_58, %c0_59, %c0_60] : memref<1x32x64xbf16, #tpu.memory_space<vmem>>, vector<1x32x64xbf16>
    %130 = vector.shape_cast %129 : vector<1x32x64xbf16> to vector<32x64xbf16>
    %c0_61 = arith.constant 0 : index
    %c0_62 = arith.constant 0 : index
    %c0_63 = arith.constant 0 : index
    %131 = vector.load %arg15[%c0_61, %c0_62, %c0_63] : memref<1x1x64xf32, #tpu.memory_space<vmem>>, vector<1x1x64xf32>
    %132 = vector.shape_cast %131 : vector<1x1x64xf32> to vector<1x64xf32>
    %c0_64 = arith.constant 0 : index
    %c0_65 = arith.constant 0 : index
    %c0_66 = arith.constant 0 : index
    %133 = vector.load %arg16[%c0_64, %c0_65, %c0_66] : memref<1x64x32xbf16, #tpu.memory_space<vmem>>, vector<1x64x32xbf16>
    %134 = vector.shape_cast %133 : vector<1x64x32xbf16> to vector<64x32xbf16>
    %c0_67 = arith.constant 0 : index
    %c0_68 = arith.constant 0 : index
    %c0_69 = arith.constant 0 : index
    %135 = vector.load %arg17[%c0_67, %c0_68, %c0_69] : memref<1x1x32xf32, #tpu.memory_space<vmem>>, vector<1x1x32xf32>
    %136 = vector.shape_cast %135 : vector<1x1x32xf32> to vector<1x32xf32>
    %137 = arith.truncf %128 : vector<16x32xf32> to vector<16x32xbf16>
    %cst_70 = arith.constant dense<0.000000e+00> : vector<16x64xf32>
    %138 = tpu.matmul %137, %130, %cst_70 {dimension_numbers = #tpu.dot_dimension_numbers<[1], [0], [0], [1], [0, 0, 1, 1], [], []>} : vector<16x32xbf16>, vector<32x64xbf16>, vector<16x64xf32> -> vector<16x64xf32>
    %139 = vector.broadcast %132 : vector<1x64xf32> to vector<16x64xf32>
    %140 = arith.addf %138, %139 : vector<16x64xf32>
    %cst_71 = arith.constant 0.000000e+00 : f32
    %141 = vector.broadcast %cst_71 : f32 to vector<16x64xf32>
    %142 = arith.maximumf %140, %141 : vector<16x64xf32>
    %143 = arith.truncf %142 : vector<16x64xf32> to vector<16x64xbf16>
    %cst_72 = arith.constant dense<0.000000e+00> : vector<16x32xf32>
    %144 = tpu.matmul %143, %134, %cst_72 {dimension_numbers = #tpu.dot_dimension_numbers<[1], [0], [0], [1], [0, 0, 1, 1], [], []>} : vector<16x64xbf16>, vector<64x32xbf16>, vector<16x32xf32> -> vector<16x32xf32>
    %145 = vector.broadcast %136 : vector<1x32xf32> to vector<16x32xf32>
    %146 = arith.addf %144, %145 : vector<16x32xf32>
    %147 = arith.addf %128, %146 : vector<16x32xf32>
    %c0_73 = arith.constant 0 : index
    %c0_74 = arith.constant 0 : index
    %c0_75 = arith.constant 0 : index
    %148 = vector.load %arg18[%c0_73, %c0_74, %c0_75] : memref<1x1x32xf32, #tpu.memory_space<vmem>>, vector<1x1x32xf32>
    %149 = vector.shape_cast %148 : vector<1x1x32xf32> to vector<1x32xf32>
    %c0_76 = arith.constant 0 : index
    %c0_77 = arith.constant 0 : index
    %c0_78 = arith.constant 0 : index
    %150 = vector.load %arg19[%c0_76, %c0_77, %c0_78] : memref<1x1x32xf32, #tpu.memory_space<vmem>>, vector<1x1x32xf32>
    %151 = vector.shape_cast %150 : vector<1x1x32xf32> to vector<1x32xf32>
    %cst_79 = arith.constant dense<0.000000e+00> : vector<16xf32>
    %152 = vector.multi_reduction <add>, %147, %cst_79 [1] : vector<16x32xf32> to vector<16xf32>
    %153 = vector.shape_cast %152 : vector<16xf32> to vector<16x1xf32>
    %cst_80 = arith.constant 3.200000e+01 : f32
    %154 = vector.broadcast %cst_80 : f32 to vector<16x1xf32>
    %155 = arith.divf %153, %154 : vector<16x1xf32>
    %156 = vector.broadcast %155 : vector<16x1xf32> to vector<16x32xf32>
    %157 = arith.subf %147, %156 : vector<16x32xf32>
    %158 = arith.mulf %157, %157 : vector<16x32xf32>
    %cst_81 = arith.constant dense<0.000000e+00> : vector<16xf32>
    %159 = vector.multi_reduction <add>, %158, %cst_81 [1] : vector<16x32xf32> to vector<16xf32>
    %160 = vector.shape_cast %159 : vector<16xf32> to vector<16x1xf32>
    %cst_82 = arith.constant 3.200000e+01 : f32
    %161 = vector.broadcast %cst_82 : f32 to vector<16x1xf32>
    %162 = arith.divf %160, %161 : vector<16x1xf32>
    %cst_83 = arith.constant 9.99999974E-6 : f32
    %163 = vector.broadcast %cst_83 : f32 to vector<16x1xf32>
    %164 = arith.addf %162, %163 : vector<16x1xf32>
    %165 = math.rsqrt %164 : vector<16x1xf32>
    %166 = vector.broadcast %165 : vector<16x1xf32> to vector<16x32xf32>
    %167 = arith.mulf %157, %166 : vector<16x32xf32>
    %168 = vector.broadcast %149 : vector<1x32xf32> to vector<16x32xf32>
    %169 = arith.mulf %167, %168 : vector<16x32xf32>
    %170 = vector.broadcast %151 : vector<1x32xf32> to vector<16x32xf32>
    %171 = arith.addf %169, %170 : vector<16x32xf32>
    %c0_84 = arith.constant 0 : index
    %c0_85 = arith.constant 0 : index
    %172 = vector.load %arg21[%c0_84, %c0_85] : memref<16x32xf32, #tpu.memory_space<vmem>>, vector<16x32xf32>
    tpu.vector_store %arg21[%c0_84, %c0_85], %171 {strides = array<i32>} : memref<16x32xf32, #tpu.memory_space<vmem>>, vector<16x32xf32>,
    %c1_i32 = arith.constant 1 : i32
    %173 = arith.cmpi eq, %arg1, %c1_i32 : i32
    %174 = arith.extui %173 : i1 to i32
    %c0_i32_86 = arith.constant 0 : i32
    %175 = arith.cmpi ne, %174, %c0_i32_86 : i32
    scf.if %175 {
      %176 = vector.shape_cast %171 : vector<16x32xf32> to vector<2x8x32xf32>
      %177 = arith.truncf %176 : vector<2x8x32xf32> to vector<2x8x32xbf16>
      %c0_87 = arith.constant 0 : index
      %c0_88 = arith.constant 0 : index
      %c0_89 = arith.constant 0 : index
      %178 = vector.load %arg20[%c0_87, %c0_88, %c0_89] : memref<2x8x32xbf16, #tpu.memory_space<vmem>>, vector<2x8x32xbf16>
      tpu.vector_store %arg20[%c0_87, %c0_88, %c0_89], %177 {strides = array<i32>} : memref<2x8x32xbf16, #tpu.memory_space<vmem>>, vector<2x8x32xbf16>,
    } else {
    }
    return
  }
  func.func @transform_0(%arg0: i32, %arg1: i32) -> (i32, i32, i32) {
    %c0_i32 = arith.constant 0 : i32
    %c0_i32_0 = arith.constant 0 : i32
    %c0_i32_1 = arith.constant 0 : i32
    return %arg0, %c0_i32, %c0_i32_0 : i32, i32, i32
  }
  func.func @transform_1(%arg0: i32, %arg1: i32) -> (i32, i32, i32, i32) {
    %c0_i32 = arith.constant 0 : i32
    %c0_i32_0 = arith.constant 0 : i32
    %c0_i32_1 = arith.constant 0 : i32
    %c0_i32_2 = arith.constant 0 : i32
    return %arg0, %c0_i32, %c0_i32_0, %c0_i32_1 : i32, i32, i32, i32
  }
  func.func @transform_2(%arg0: i32, %arg1: i32) -> (i32, i32, i32) {
    %c0_i32 = arith.constant 0 : i32
    %c0_i32_0 = arith.constant 0 : i32
    %c0_i32_1 = arith.constant 0 : i32
    return %arg1, %c0_i32, %c0_i32_0 : i32, i32, i32
  }
  func.func @transform_3(%arg0: i32, %arg1: i32) -> (i32, i32, i32) {
    %c0_i32 = arith.constant 0 : i32
    %c0_i32_0 = arith.constant 0 : i32
    %c0_i32_1 = arith.constant 0 : i32
    return %arg1, %c0_i32, %c0_i32_0 : i32, i32, i32
  }
  func.func @transform_4(%arg0: i32, %arg1: i32) -> (i32, i32, i32) {
    %c0_i32 = arith.constant 0 : i32
    %c0_i32_0 = arith.constant 0 : i32
    %c0_i32_1 = arith.constant 0 : i32
    return %arg1, %c0_i32, %c0_i32_0 : i32, i32, i32
  }
  func.func @transform_5(%arg0: i32, %arg1: i32) -> (i32, i32, i32) {
    %c0_i32 = arith.constant 0 : i32
    %c0_i32_0 = arith.constant 0 : i32
    %c0_i32_1 = arith.constant 0 : i32
    return %arg1, %c0_i32, %c0_i32_0 : i32, i32, i32
  }
  func.func @transform_6(%arg0: i32, %arg1: i32) -> (i32, i32, i32) {
    %c0_i32 = arith.constant 0 : i32
    %c0_i32_0 = arith.constant 0 : i32
    %c0_i32_1 = arith.constant 0 : i32
    return %arg1, %c0_i32, %c0_i32_0 : i32, i32, i32
  }
  func.func @transform_7(%arg0: i32, %arg1: i32) -> (i32, i32, i32) {
    %c0_i32 = arith.constant 0 : i32
    %c0_i32_0 = arith.constant 0 : i32
    %c0_i32_1 = arith.constant 0 : i32
    return %arg1, %c0_i32, %c0_i32_0 : i32, i32, i32
  }
  func.func @transform_8(%arg0: i32, %arg1: i32) -> (i32, i32, i32) {
    %c0_i32 = arith.constant 0 : i32
    %c0_i32_0 = arith.constant 0 : i32
    %c0_i32_1 = arith.constant 0 : i32
    return %arg1, %c0_i32, %c0_i32_0 : i32, i32, i32
  }
  func.func @transform_9(%arg0: i32, %arg1: i32) -> (i32, i32, i32) {
    %c0_i32 = arith.constant 0 : i32
    %c0_i32_0 = arith.constant 0 : i32
    %c0_i32_1 = arith.constant 0 : i32
    return %arg1, %c0_i32, %c0_i32_0 : i32, i32, i32
  }
  func.func @transform_10(%arg0: i32, %arg1: i32) -> (i32, i32, i32) {
    %c0_i32 = arith.constant 0 : i32
    %c0_i32_0 = arith.constant 0 : i32
    %c0_i32_1 = arith.constant 0 : i32
    return %arg1, %c0_i32, %c0_i32_0 : i32, i32, i32
  }
  func.func @transform_11(%arg0: i32, %arg1: i32) -> (i32, i32, i32) {
    %c0_i32 = arith.constant 0 : i32
    %c0_i32_0 = arith.constant 0 : i32
    %c0_i32_1 = arith.constant 0 : i32
    return %arg1, %c0_i32, %c0_i32_0 : i32, i32, i32
  }
  func.func @transform_12(%arg0: i32, %arg1: i32) -> (i32, i32, i32) {
    %c0_i32 = arith.constant 0 : i32
    %c0_i32_0 = arith.constant 0 : i32
    %c0_i32_1 = arith.constant 0 : i32
    return %arg1, %c0_i32, %c0_i32_0 : i32, i32, i32
  }
  func.func @transform_13(%arg0: i32, %arg1: i32) -> (i32, i32, i32) {
    %c0_i32 = arith.constant 0 : i32
    %c0_i32_0 = arith.constant 0 : i32
    %c0_i32_1 = arith.constant 0 : i32
    return %arg1, %c0_i32, %c0_i32_0 : i32, i32, i32
  }
  func.func @transform_14(%arg0: i32, %arg1: i32) -> (i32, i32, i32) {
    %c0_i32 = arith.constant 0 : i32
    %c0_i32_0 = arith.constant 0 : i32
    %c0_i32_1 = arith.constant 0 : i32
    return %arg1, %c0_i32, %c0_i32_0 : i32, i32, i32
  }
  func.func @transform_15(%arg0: i32, %arg1: i32) -> (i32, i32, i32) {
    %c0_i32 = arith.constant 0 : i32
    %c0_i32_0 = arith.constant 0 : i32
    %c0_i32_1 = arith.constant 0 : i32
    return %arg1, %c0_i32, %c0_i32_0 : i32, i32, i32
  }
  func.func @transform_16(%arg0: i32, %arg1: i32) -> (i32, i32, i32) {
    %c0_i32 = arith.constant 0 : i32
    %c0_i32_0 = arith.constant 0 : i32
    %c0_i32_1 = arith.constant 0 : i32
    return %arg1, %c0_i32, %c0_i32_0 : i32, i32, i32
  }
  func.func @transform_17(%arg0: i32, %arg1: i32) -> (i32, i32, i32) {
    %c0_i32 = arith.constant 0 : i32
    %c0_i32_0 = arith.constant 0 : i32
    %c0_i32_1 = arith.constant 0 : i32
    return %arg1, %c0_i32, %c0_i32_0 : i32, i32, i32
  }
  func.func @transform_18(%arg0: i32, %arg1: i32) -> (i32, i32, i32) {
    %c0_i32 = arith.constant 0 : i32
    %c0_i32_0 = arith.constant 0 : i32
    %c0_i32_1 = arith.constant 0 : i32
    return %arg0, %c0_i32, %c0_i32_0 : i32, i32, i32
  }
}

</mosaic_0001>

<bundles_post_ra>
// kernel: tpu_custom_call.1
= control target key start
LH: loop header
LB: loop body
LE: loop exit
PB: predicated region body
PF: predicated region fallthrough
CT: control target
= control target key end

     0   :  { %s6889_s0 = inlined_call_operand.hbm [shape: f32[2,8,32], index: 0, kind: input, shape index: {}]   ;;  %s6890_s1 = inlined_call_operand.vmem [shape: bf16[2,1,1,8], index: 1, kind: input, shape index: {}]   ;;  %s6891_s2 = inlined_call_operand.vmem [shape: bf16[2,32,32], index: 2, kind: input, shape index: {}]   ;;  %s6892_s3 = inlined_call_operand.vmem [shape: f32[2,1,32], index: 3, kind: input, shape index: {}]   ;;  %s6893_s4 = inlined_call_operand.vmem [shape: bf16[2,32,32], index: 4, kind: input, shape index: {}]   ;;  %s6894_s5 = inlined_call_operand.vmem [shape: f32[2,1,32], index: 5, kind: input, shape index: {}]   ;;  %s6895_s6 = inlined_call_operand.vmem [shape: bf16[2,32,32], index: 6, kind: input, shape index: {}]   ;;  %s6896_s7 = inlined_call_operand.vmem [shape: f32[2,1,32], index: 7, kind: input, shape index: {}]   ;;  %s6897_s8 = inlined_call_operand.hbm [shape: bf16[2,32,32], index: 8, kind: input, shape index: {}]   ;;  %s6898_s9 = inlined_call_operand.vmem [shape: f32[2,1,32], index: 9, kind: input, shape index: {}]   ;;  %s6899_s10 = inlined_call_operand.vmem [shape: f32[2,1,32], index: 10, kind: input, shape index: {}]   ;;  %s6900_s11 = inlined_call_operand.vmem [shape: f32[2,1,32], index: 11, kind: input, shape index: {}]   ;;  %s6901_s12 = inlined_call_operand.hbm [shape: bf16[2,32,64], index: 12, kind: input, shape index: {}]   ;;  %s6902_s13 = inlined_call_operand.vmem [shape: f32[2,1,64], index: 13, kind: input, shape index: {}]   ;;  %s6903_s14 = inlined_call_operand.vmem [shape: bf16[2,64,32], index: 14, kind: input, shape index: {}]   ;;  %s6904_s15 = inlined_call_operand.vmem [shape: f32[2,1,32], index: 15, kind: input, shape index: {}]   ;;  %s6905_s16 = inlined_call_operand.vmem [shape: f32[2,1,32], index: 16, kind: input, shape index: {}]   ;;  %s6906_s17 = inlined_call_operand.vmem [shape: f32[2,1,32], index: 17, kind: input, shape index: {}]   ;;  %s6907_s18 = inlined_call_operand.hbm [shape: bf16[2,8,32], index: 18, kind: output, shape index: {}]  }
   0x1   :  { %6919 = sst [smem:[#allocation20_spill]] %s6889_s0 }
   0x2   :  { %6920 = sst [smem:[#allocation21_spill]] %s6890_s1 }
   0x3   :  { %6921 = sst [smem:[#allocation22_spill]] %s6891_s2 }
   0x4   :  { %6922 = sst [smem:[#allocation23_spill]] %s6893_s4 }
   0x5   :  { %6923 = sst [smem:[#allocation24_spill]] %s6895_s6 }
   0x6   :  { %6924 = sst [smem:[#allocation25_spill]] %s6897_s8 }
   0x7   :  { %6925 = sst [smem:[#allocation26_spill]] %s6899_s10 }
   0x8   :  { %6926 = sst [smem:[#allocation27_spill]] %s6900_s11 }
   0x9   :  { %6927 = sst [smem:[#allocation28_spill]] %s6901_s12 }
   0xa   :  { %6928 = sst [smem:[#allocation29_spill]] %s6904_s15 }
   0xb   :  { %6929 = sst [smem:[#allocation30_spill]] %s6905_s16 }
   0xc   :  { %6930 = sst [smem:[#allocation31_spill]] %s6906_s17 }
   0xd   :  { %6931 = sst [smem:[#allocation32_spill]] %s6907_s18 }
   0xe   :  { %23 = vsyncpa [#allocation4], 0 }
   0xf   :  { %24 = vsyncpa [#allocation7], 0 }
  0x10   :  { %26 = vsyncpa [#allocation7 + $0x1], 0 }
  0x11   :  { %27 = vsyncpa [#allocation5], 0  ;;  %s6142_s27 = smov 0   ;;  %s6144_s28 = smov 0  }
  0x12   :  { %s6146_s29 = smov 0   ;;  %s6148_s30 = smov 0  }
  0x13   :  { %s6150_s0 = smov 0   ;;  %s6152_s19 = smov 0  }
  0x14 LB: > { %6932 = sst [smem:[#allocation13_spill]] %s6008_s28  ;;  %s42_s1 = sadd.s32 1, %s6020_s0  ;;  %s6024_s19 = sphi %s6152_s19, %s33_s19   ;;  %s6020_s0 = sphi %s6150_s0, %s6978_s0   ;;  %s6016_s30 = sphi %s6148_s30, %s6977_s30   ;;  %s6012_s29 = sphi %s6146_s29, %s6976_s29   ;;  %s6008_s28 = sphi %s6144_s28, %s6975_s28   ;;  %s6004_s27 = sphi %s6142_s27, %s6974_s27  }
  0x15   : > { %6933 = sst [smem:[#allocation14_spill]] %s6012_s29  ;;  %s260_s20 = sadd.s32 1, %s6012_s29 }
  0x16   : > { %6934 = sst [smem:[#allocation15_spill]] %s6020_s0  ;;  %p43_p0 = scmp.ge.s32.totalorder %s42_s1, 2 }
  0x17   : > { %6935 = sst [smem:[#allocation16_spill]] %s6024_s19  ;;  %p267_p1 = scmp.ne.s32.totalorder %s6012_s29, %s6008_s28 }
  0x18   : > { %p268_p2 = scmp.eq.s32.totalorder %s6024_s19, 0  ;;  %s6980_s1 = smov (%p43_p0, %s42_s1), 0 }
  0x19   : > { %6936 = sst [smem:[#allocation17_spill]] %s6980_s1  ;;  %p5730_p4 = scmp.lt.s32.totalorder %s6024_s19, 2 }
  0x1a   : > { %p269_p3 = por %p268_p2, %p267_p1  ;;  %s257_s21 = ssub.s32 %s6020_s0, %s6980_s1 }
  0x1b   : > { %s623_s22 = sand.u32 1, %s6024_s19   ;;  %p258_p5 = scmp.eq.s32.totalorder %s257_s21, 0 }
  0x1c   : > { %s625_s2 = sand.u32 1, %s6012_s29   ;;  %s6910_s23 = sshll.u32 %s6020_s0, 8 }
  0x1d   : > { %s6186_s24 = scalar_select %p258_p5, %s6012_s29, %s260_s20  }
  0x1e   : > { %s5418_s25 = sshll.u32 %s625_s2, 4  ;;  %s6938_s8 = sld [smem:[#allocation25_spill]] }
  0x1f   : > { %6937 = sst [smem:[#allocation18_spill]] %s6186_s24  ;;  %p6193_p6 = pnand %p5730_p4, %p269_p3 }
  0x20   : > { %s627_s15 = scalar_lea.vmem [#allocation6], %s5418_s25  ;;  %s6197_s21 = scalar_lea.sflag [#allocation7], %s623_s22 }
  0x21   : > { %s634_s1 = sshll.u32 %s627_s15, 4  ;;  %p5862_p7 = pneg %p6193_p6  ;;  %s635_s1 = int_to_ptr.vmem [resolvable:$true] %s634_s1 }
  0x22   : > { %s5873_s20 = scalar_lea.vmem %s635_s1, 256  ;;  %s6026_s18 = smov [#allocation6]  }
  0x23   : > { %p5874_p8 = scmp.ne.s32.totalorder %s635_s1, %s5873_s20  ;;  %s5878_s2 = sshll.u32 %s6026_s18, 4  ;;  %s5879_s2 = int_to_ptr.vmem [resolvable:$false] %s5878_s2 }
  0x24   : > { %s633_s17 = scalar_lea.hbm %s6938_s8, %s6910_s23  ;;  %s5880_s26 = scalar_lea.vmem %s5879_s2, 512 }
  0x25   : > { %p5876_p9 = pnand %p5874_p8, %p5862_p7  ;;  %p5881_p11 = scmp.lt.s32.totalorder %s635_s1, %s5879_s2 }
  0x26   : > { %p5882_p12 = scmp.lt.s32.totalorder %s5880_s26, %s5873_s20 }
  0x27   : > { %p5877_p10 = pneg %p5876_p9 }
  0x28   : > { %p5883_p13 = por %p5882_p12, %p5881_p11 }
  0x2a   : > { %p5884_p0 = pnand %p5883_p13, %p5877_p10 }
  0x2c   : > { %5887 = shalt.err (!%p5884_p0)
}
  0x2d   : > { %s6911_s15 = smov 64   ;;  %s6912_s22 = smov 4  }
  0x2e   : > { %5725 = dma.hbm_to_vmem [thread:$0]  (!%p6193_p6), %s633_s17, 256, %s635_s1, %s6197_s21, %s6911_s15, %s6911_s15, %s6912_s22  }
  0x2f   : > { %s666_s18 = scalar_lea.vmem [#allocation8], %s5418_s25  ;;  %s6211_s2 = sadd.s32 4294967295, %s6024_s19  }
  0x30   : > { %s673_s20 = sshll.u32 %s666_s18, 4  ;;  %6940 = sst [smem:[#allocation19_spill]] %s6211_s2  ;;  %s674_s20 = int_to_ptr.vmem [resolvable:$true] %s673_s20 }
  0x31   : > { %p273_p1 = scmp.ne.s32.totalorder %s6008_s28, %s6004_s27  ;;  %p274_p2 = scmp.eq.s32.totalorder %s6211_s2, 0 }
  0x32   : > { %p5414_p3 = scmp.ge.s32.totalorder %s6024_s19, 1  ;;  %p544_p4 = scmp.lt.s32.totalorder %s6024_s19, 3 }
  0x33   : > { %p6220_p5 = por %p274_p2, %p273_p1  ;;  %s6943_s17 = sshll.u32 %s6020_s0, 8 }
  0x34   : > { %p6224_p8 = pnand %p5414_p3, %p544_p4  ;;  %s6944_s12 = sld [smem:[#allocation28_spill]] }
  0x35   : > { %s6029_s15 = smov [#allocation3]   ;;  %s5901_s8 = scalar_lea.vmem %s674_s20, 256 }
  0x36   : > { %s559_s27 = sshll.u32 %s6029_s15, 4  ;;  %p5718_p9 = pneg %p6224_p8  ;;  %s6235_s27 = int_to_ptr.vmem [resolvable:$true] %s559_s27 }
  0x37   : > { %p5902_p11 = scmp.ne.s32.totalorder %s674_s20, %s5901_s8  ;;  %s6030_s1 = smov [#allocation8]  }
  0x38   : > { %p6239_p10 = pnand %p5718_p9, %p274_p2 }
  0x39   : > { %p5904_p12 = pnand %p5902_p11, %p5862_p7 }
  0x3a   : > { %s672_s18 = scalar_lea.hbm %s6944_s12, %s6943_s17  ;;  %s5906_s17 = sshll.u32 %s6030_s1, 4  ;;  %s5907_s17 = int_to_ptr.vmem [resolvable:$false] %s5906_s17 }
  0x3b   : > { %p5905_p13 = pneg %p5904_p12  ;;  %s5908_s15 = scalar_lea.vmem %s5907_s17, 512 }
  0x3c   : > { %p5909_p0 = scmp.lt.s32.totalorder %s674_s20, %s5907_s17  ;;  %p5910_p1 = scmp.lt.s32.totalorder %s5908_s15, %s5901_s8 }
  0x3e   : > { %p5911_p3 = por %p5910_p1, %p5909_p0 }
  0x40   : > { %p5912_p4 = pnand %p5911_p3, %p5905_p13 }
  0x42   : > { %5915 = shalt.err (!%p5912_p4)
}
  0x43   : > { %s6946_s25 = smov 4   ;;  %s6947_s12 = smov 64  }
  0x44   : > { %5728 = dma.hbm_to_vmem [thread:$0]  (!%p6193_p6), %s672_s18, 256, %s674_s20, %s6197_s21, %s6947_s12, %s6947_s12, %s6946_s25  }
  0x45   : > { %p5918_p7 = pneg %p6239_p10  ;;  %s5927_s1 = scalar_lea.vmem %s6235_s27, 256 }
  0x46   : > { %p5928_p9 = scmp.ne.s32.totalorder %s6235_s27, %s5927_s1  ;;  %p5935_p13 = scmp.lt.s32.totalorder %s6235_s27, %s6235_s27 }
  0x47   : > { %p5936_p0 = scmp.lt.s32.totalorder %s5927_s1, %s5927_s1 }
  0x48   : > { %p5930_p11 = pnand %p5928_p9, %p5918_p7 }
  0x49   : > { %p5937_p1 = por %p5936_p0, %p5935_p13 }
  0x4a   : > { %p5931_p12 = pneg %p5930_p11 }
  0x4c   : > { %p5938_p3 = pnand %p5937_p1, %p5931_p12 }
  0x4e   : > { %5941 = shalt.err (!%p5938_p3)
}
  0x4f   : > { %s6031_s8 = smov 128   ;;  %s6032_s16 = smov 8  }
  0x50   : > { %s6948_s12 = sld [smem:[#allocation20_spill]] }
  0x52   : > { %717 = sbr.rel (%p6224_p8) target bundleno = 2988 (0xbac), region = 92 }
  0x56   : > { %5721 = dma.hbm_to_vmem [thread:$0]  (!%p6239_p10), %s6948_s12, 256, %s6235_s27, [#allocation4], %s6031_s8, %s6031_s8, %s6032_s16  }
  0x57   : > { %5991 = dma.done.wait (%p274_p2), [#allocation4], 256  }
  0x58   : > { %5993 = vsyncadd (%p274_p2), [#allocation4], 4294967040  ;;  %s723_s21 = sand.u32 1, %s6211_s2   ;;  %s725_s20 = sand.u32 1, %s6008_s28  }
  0x59   : > { %s6272_s18 = sshll.u32 %s725_s20, 4  ;;  %s724_s22 = scalar_lea.sflag [#allocation7], %s723_s21 }
  0x5a   : > { %5995 = dma.done.wait (%p6220_p5), %s724_s22, 512  }
  0x5b   : > { %5997 = vsyncadd (%p6220_p5), %s724_s22, 4294966784  ;;  %p849_p6 = scmp.lt.s32.totalorder %s6016_s30, 1  ;;  %s6949_s15 = sld [smem:[#allocation22_spill]] }
  0x5c   : > { %s6950_s4 = sld [smem:[#allocation23_spill]]  ;;  %s736_s24 = scalar_lea.vmem [#allocation8], %s6272_s18 }
  0x5d   : > { %s6281_s23 = scalar_select %p849_p6, %s6016_s30, 1 }
  0x5e   : > { %s6951_s6 = sld [smem:[#allocation24_spill]]  ;;  %p5436_p2 = scmp.ne.s32.totalorder %s6016_s30, 0 }
  0x5f   : > { %s5502_s27 = sshll.u32 %s6281_s23, 4  ;;  %s884_s29 = scalar_lea.vmem %s6902_s13, %s6281_s23 }
  0x60   : > { %s6955_s20 = sld [smem:[#allocation30_spill]] }
  0x61   : > { %s6291_s12 = scalar_lea.vmem %s6949_s15, %s5502_s27  ;;  %s6954_s15 = sld [smem:[#allocation29_spill]] }
  0x62   : > { %s861_s22 = scalar_lea.vmem %s6950_s4, %s5502_s27  ;;  %s6956_s25 = sld [smem:[#allocation31_spill]] }
  0x64   : > { %s6303_s19 = scalar_lea.vmem %s6951_s6, %s5502_s27  ;;  %s5505_s27 = sshll.u32 %s6281_s23, 5 }
  0x65   : > { %s6329_s1 = scalar_lea.vmem %s6903_s14, %s5505_s27  ;;  %906 = sbr.rel (%p5436_p2) target bundleno = 108 (0x6c), region = 108 }
  0x66   : > { %s895_s10 = scalar_lea.vmem %s6955_s20, %s6281_s23 }
  0x67   : > { %s892_s8 = scalar_lea.vmem %s6954_s15, %s6281_s23 }
  0x68   : > { %s898_s11 = scalar_lea.vmem %s6956_s25, %s6281_s23 }
  0x6a   : > { %v907_v0 = vld [vmem:[#allocation3] sm:$0xff]  ;;  %vm909_vm0 = vcmask 261120   ;;  %v908_v1 = vld [vmem:[#allocation3 + $0x8] sm:$0xff] }
  0x6b   : > { %910 = vst.msk [vmem:[#allocation2] sm:$0xff] %vm909_vm0, %v907_v0  ;;  %911 = vst.msk [vmem:[#allocation2 + $0x8] sm:$0xff] %vm909_vm0, %v908_v1 }
  0x6c PF: > { %v5816_v2 = vld [vmem:[%s861_s22 + $0x8] sm:$0xff]   ;;  %v6033_v3 = vmov 0.0   ;;  %v5817_v4 = vld [vmem:[%s861_s22] sm:$0xff]   ;;  %vm6034_vm1 = vmmov 0   ;;  %vm955_vm2 = vcmask 261120   ;;  %s6957_s22 = scalar_lea.vmem %s6894_s5, %s6281_s23  ;;  %s6036_s15 = smov 120   ;;  %v1143_v27 = vlaneseq }
  0x6d   : > { %5566 = vmatprep.subr.bf16.mxu1 %v6033_v3  ;;  %5558 = vmatprep.subr.bf16.mxu0 %v6033_v3  ;;  %v5818_v7 = vld [vmem:[%s6291_s12 + $0x8] sm:$0xff]   ;;  %v5819_v8 = vld [vmem:[%s6291_s12] sm:$0xff]   ;;  %s6037_s20 = smov 112   ;;  %s6958_s27 = scalar_lea.vmem %s6892_s3, %s6281_s23  ;;  %v6038_v25 = vmov 1983009808   ;;  %vm2118_vm3 = vcmask 1043456  }
  0x6e   : > { %5567 = vmatpush3.bf16.msra.mxu1 %v5816_v2  ;;  %5570 = vmatprep.mubr.msk.bf16.mxu1 %vm6034_vm1, %v6033_v3  ;;  %v5820_v10 = vld [vmem:[%s6303_s19 + $0x8] sm:$0xff]   ;;  %v5821_v11 = vld [vmem:[%s6303_s19] sm:$0xff]   ;;  %s6035_s19 = smov 104   ;;  %v1141_v26 = vunpack.c.l.s4 %v6038_v25  ;;  %v6039_v28 = vmov 1934713408   ;;  %v6387_v31 = vshrl.u32 %v1143_v27, 7  ;;  %s6959_s17 = scalar_lea.vmem %s6896_s7, %s6281_s23 }
  0x6f   : > { %5568 = vmatprep.subr.bf16.mxu1 %v6033_v3  ;;  %5562 = vmatprep.mubr.msk.bf16.mxu0 %vm6034_vm1, %v6033_v3  ;;  %v5441_v12 = vld [vmem:[%s6957_s22] ss:$0 sm:$0xff]  ;;  %v1173_v29 = vunpack.c.l.s4 %v6039_v28  ;;  %vm2114_vm4 = vcmask 64512   ;;  %s6960_s4 = sld [smem:[#allocation21_spill]]  ;;  %s6961_s12 = scalar_lea.vmem [#allocation6], %s6272_s18  ;;  %vm3232_vm11 = vcmask 130048  }
  0x70   : > { %5559 = vmatpush3.bf16.msra.mxu0 %v5818_v7  ;;  %v5437_v21 = vld [vmem:[%s6958_s27] ss:$0 sm:$0xff]  ;;  %v1142_v30 = vunpack.c.0.s8 %v1141_v26  ;;  %s6962_s22 = smov %s6961_s12  ;;  %vm3234_vm12 = vcmask 195584   ;;  %s6963_s27 = scalar_lea.vmem %s6898_s9, %s6281_s23  ;;  %vm5054_vm13 = vcmask 523264  }
  0x71   : > { %5560 = vmatprep.subr.bf16.mxu0 %v6033_v3  ;;  %v1174_v34 = vunpack.c.0.s8 %v1173_v29  ;;  %v5445_v7 = vld [vmem:[%s6959_s17] ss:$0 sm:$0xff]  ;;  %s6964_s26 = sld [smem:[#allocation26_spill]]  ;;  %p5495_p5 = scmp.ne.s32.totalorder %s6016_s30, 1 }
  0x72   : > { %v912_v5 = vld [vmem:[#allocation2] sm:$0xff]  ;;  %v913_v6 = vld [vmem:[#allocation2 + $0x8] sm:$0xff]  ;;  %5569 = vmatpush3.bf16.msra.mxu1 %v5817_v4  ;;  %v6390_v35 = vsub.s32 %v1142_v30, %v6387_v31  ;;  %s6966_s21 = sld [smem:[#allocation27_spill]] }
  0x73   : > { %v914_v9 = vpack.c.bf16 %v913_v6, %v912_v5  ;;  %5582 = vmatprep.subr.bf16.mxu1 %v6033_v3  ;;  %v6393_v41 = vsub.s32 %v1174_v34, %v6387_v31 }
  0x74   : > { %5561 = vmatpush3.bf16.msra.mxu0 %v5819_v8 }
  0x75   : > { %5571 = vmatmul.mubr.msk.bf16.vlgmr.msra.gmra.mxu1 %vm955_vm2, %v914_v9  ;;  %5574 = vmatprep.subr.bf16.mxu0 %v6033_v3 }
  0x76   : > { %5584 = vmatprep.mubr.msk.bf16.mxu1 %vm6034_vm1, %v6033_v3 }
  0x77   : > { %5563 = vmatmul.mubr.msk.bf16.vlgmr.msra.gmra.mxu0 %vm955_vm2, %v914_v9  ;;  %s6965_s16 = scalar_lea.vmem %s6964_s26, %s6281_s23 }
  0x78   : > { %5578 = vmatprep.mubr.msk.bf16.mxu0 %vm6034_vm1, %v6033_v3  ;;  %5575 = vmatpush3.bf16.msra.mxu0 %v5820_v10  ;;  %s6967_s0 = scalar_lea.vmem %s6966_s21, %s6281_s23 }
  0x79   : > { %5576 = vmatprep.subr.bf16.mxu0 %v6033_v3 }
  0x7c   : > { %5577 = vmatpush3.bf16.msra.mxu0 %v5821_v11 }
  0x7d   : > { %5588 = vmatprep.subr.bf16.mxu0 %v6033_v3 }
  0x7f   : > { %5579 = vmatmul.mubr.msk.bf16.vlgmr.msra.gmra.mxu0 %vm955_vm2, %v914_v9 }
  0x80   : > { %5590 = vmatprep.mubr.msk.bf16.mxu0 %vm6034_vm1, %v6033_v3 }
 0x135   : > { %v1052_v13 = vpop.f32.mrf.mxu1 }
 0x136   : > { %v1053_v14 = vadd.f32 %v5441_v12, %v1052_v13 }
 0x137   : > { %v5572_v15 = vpop.f32.mrf.mxu1  ;;  %v993_v19 = vpop.f32.mrf.mxu0 }
 0x138   : > { %1304 = vrot.lane.b32.xlu1 %v1053_v14, %s6035_s19  ;;  %1292 = vrot.lane.b32.xlu0 %v1053_v14, %s6036_s15  ;;  %v6409_v6 = vadd.f32 %v5437_v21, %v993_v19 }
 0x139   : > { %v1055_v16 = vpop.f32.mrf.mxu1  ;;  %v5564_v20 = vpop.f32.mrf.mxu0 }
 0x13a   : > { %v6377_v17 = vadd.f32 %v5441_v12, %v1055_v16 }
 0x13b   : > { %v5573_v18 = vpop.f32.mrf.mxu1  ;;  %v996_v22 = vpop.f32.mrf.mxu0 }
 0x13c   : > { %1298 = vrot.lane.b32.xlu0 %v1053_v14, %s6037_s20  ;;  %v6385_v23 = vadd.f32 %v5437_v21, %v996_v22 }
 0x13d   : > { %v5565_v24 = vpop.f32.mrf.mxu0 }
 0x13f   : > { %v6405_v60 = vpop.f32.mrf.mxu0 }
 0x141   : > { %v5580_v61 = vpop.f32.mrf.mxu0 }
 0x143   : > { %v1114_v5 = vpop.f32.mrf.mxu0 }
 0x144   : > { %v6416_v9 = vadd.f32 %v5445_v7, %v1114_v5 }
 0x145   : > { %v5581_v8 = vpop.f32.mrf.mxu0 }
 0x1aa   : > { %v1305_v32 = vpop.permute.xlu1 %1304  ;;  %v1293_v33 = vpop.permute.xlu0 %1292 }
 0x1ab   : > { %v1326_v36 = vcombine.low %v1293_v33, %v1305_v32  ;;  %v1327_v37 = vcombine.high %v1293_v33, %v1305_v32 }
 0x1ad   : > { %v1334_v42 = vrot.slane %v1326_v36, %v6390_v35  ;;  %v1341_v43 = vrot.slane %v1327_v37, %v6390_v35 }
 0x1ae   : > { %v1299_v38 = vpop.permute.xlu0 %1298 }
 0x1af   : > { %v1310_v39 = vcombine.low %v1053_v14, %v1299_v38  ;;  %v1311_v40 = vcombine.high %v1053_v14, %v1299_v38 }
 0x1b1   : > { %v1318_v44 = vrot.slane %v1310_v39, %v6390_v35  ;;  %v1325_v45 = vrot.slane %v1311_v40, %v6390_v35 }
 0x1b3   : > { %v1343_v46 = vcombine.high %v1318_v44, %v1334_v42  ;;  %v1342_v47 = vcombine.low %v1318_v44, %v1334_v42  ;;  %v1358_v48 = vcombine.low %v1325_v45, %v1341_v43  ;;  %v1359_v51 = vcombine.high %v1325_v45, %v1341_v43 }
 0x1b4   : > { %v6040_v42 = vmov 0  }
 0x1b5   : > { %v1357_v49 = vrot.slane %v1343_v46, %v6393_v41  ;;  %v1350_v50 = vrot.slane %v1342_v47, %v6393_v41  ;;  %v1366_v54 = vrot.slane %v1358_v48, %v6393_v41  ;;  %v1373_v58 = vrot.slane %v1359_v51, %v6393_v41 }
 0x1b7   : > { %v1448_v52 = vpack.c.bf16 %v1357_v49, %v1357_v49  ;;  %v1446_v53 = vpack.c.bf16 %v1350_v50, %v1350_v50  ;;  %v1375_v55 = vcombine.high %v1357_v49, %v6033_v3  ;;  %v1450_v56 = vpack.c.bf16 %v1366_v54, %v1366_v54 }
 0x1b8   : > { %v1376_v59 = vcombine.high %v1366_v54, %v6033_v3  ;;  %v1452_v62 = vpack.c.bf16 %v1373_v58, %v1373_v58  ;;  %v1377_v0 = vcombine.high %v1373_v58, %v6033_v3  ;;  %v1374_v1 = vcombine.high %v1350_v50, %v6033_v3 }
 0x1b9   : > { %1728 = vxpose.xlu0.c.b16.start.end [1/1] (short) (narrow) %v1448_v52, 16  ;;  %1696 = vxpose.xlu1.c.b16.start.end [1/1] (short) (narrow) %v1446_v53, 16  ;;  %v1449_v57 = vpack.c.bf16 %v1375_v55, %v1375_v55  ;;  %v6437_v55 = vadd.f32 %v5445_v7, %v6405_v60 }
 0x1ba   : > { %v1451_v63 = vpack.c.bf16 %v1376_v59, %v1376_v59  ;;  %v1453_v2 = vpack.c.bf16 %v1377_v0, %v1377_v0  ;;  %v1447_v4 = vpack.c.bf16 %v1374_v1, %v1374_v1 }
 0x1bd   : > { %1760 = vxpose.xlu0.c.b16.start.end [1/1] (short) (narrow) %v1450_v56, 16  ;;  %1744 = vxpose.xlu1.c.b16.start.end [1/1] (short) (narrow) %v1449_v57, 16 }
 0x1c1   : > { %1792 = vxpose.xlu0.c.b16.start.end [1/1] (short) (narrow) %v1452_v62, 16  ;;  %1776 = vxpose.xlu1.c.b16.start.end [1/1] (short) (narrow) %v1451_v63, 16 }
 0x1c5   : > { %1808 = vxpose.xlu1.c.b16.start.end [1/1] (short) (narrow) %v1453_v2, 16  ;;  %1712 = vxpose.xlu0.c.b16.start.end [1/1] (short) (narrow) %v1447_v4, 16 }
 0x1c9   : > { %1126 = vrot.lane.b32.xlu1 %v6409_v6, %s6037_s20 }
 0x1cd   : > { %1132 = vrot.lane.b32.xlu1 %v6409_v6, %s6035_s19 }
 0x1ce   : > { %1120 = vrot.lane.b32.xlu0 %v6409_v6, %s6036_s15 }
 0x21b   : > { %v1736_v10 = vpop.trf.xlu0  ;;  %v1704_v11 = vpop.trf.xlu1 }
 0x21f   : > { %v1768_v12 = vpop.trf.xlu0  ;;  %v1752_v13 = vpop.trf.xlu1 }
 0x220   : > { %v1824_v16 = vcombine.low %v1704_v11, %v1768_v12 }
 0x222   : > { %v1831_v22 = vrot.slane %v1824_v16, %v6390_v35 }
 0x223   : > { %v1800_v14 = vpop.trf.xlu0  ;;  %v1784_v15 = vpop.trf.xlu1 }
 0x224   : > { %v1832_v18 = vcombine.low %v1736_v10, %v1800_v14 }
 0x226   : > { %v1839_v19 = vrot.slane %v1832_v18, %v6390_v35 }
 0x227   : > { %v1816_v20 = vpop.trf.xlu1  ;;  %v1720_v21 = vpop.trf.xlu0 }
 0x228   : > { %v1866_v24 = vcombine.low %v1752_v13, %v1816_v20  ;;  %v1858_v25 = vcombine.low %v1720_v21, %v1784_v15  ;;  %v1840_v26 = vcombine.low %v1831_v22, %v1839_v19  ;;  %v1841_v27 = vcombine.high %v1831_v22, %v1839_v19 }
 0x22a   : > { %v1873_v28 = vrot.slane %v1866_v24, %v6390_v35  ;;  %v1865_v29 = vrot.slane %v1858_v25, %v6390_v35  ;;  %v1848_v33 = vrot.slane %v1840_v26, %v6393_v41  ;;  %v1855_v34 = vrot.slane %v1841_v27, %v6393_v41 }
 0x22c   : > { %v1874_v30 = vcombine.low %v1865_v29, %v1873_v28  ;;  %v1875_v32 = vcombine.high %v1865_v29, %v1873_v28  ;;  %v1896_v44 = vshrl.u32 %v1848_v33, 16  ;;  %v1856_v45 = vcombine.high %v1848_v33, %v6040_v42 }
 0x22d   : > { %v1857_v50 = vcombine.high %v1855_v34, %v6040_v42  ;;  %v1912_v51 = vshrl.u32 %v1855_v34, 16 }
 0x22e   : > { %v1882_v36 = vrot.slane %v1874_v30, %v6393_v41  ;;  %v1889_v37 = vrot.slane %v1875_v32, %v6393_v41  ;;  %v1904_v56 = vshrl.u32 %v1856_v45, 16 }
 0x22f   : > { %v1920_v59 = vshrl.u32 %v1857_v50, 16 }
 0x230   : > { %v1910_v38 = vpack.i.b16 %v1889_v37, %v1855_v34  ;;  %v1894_v39 = vpack.i.b16 %v1882_v36, %v1848_v33  ;;  %v1897_v40 = vshrl.u32 %v1882_v36, 16  ;;  %v1890_v43 = vcombine.high %v1882_v36, %v6040_v42 }
 0x231   : > { %v1891_v48 = vcombine.high %v1889_v37, %v6040_v42  ;;  %v1913_v49 = vshrl.u32 %v1889_v37, 16 }
 0x232   : > { %1988 = vxpose.xlu1.c.b16.start.end [1/1] (short) (narrow) %v1910_v38, 16  ;;  %1924 = vxpose.xlu0.c.b16.start.end [1/1] (short) (narrow) %v1894_v39, 16  ;;  %v1898_v46 = vpack.i.b16 %v1897_v40, %v1896_v44  ;;  %v1902_v47 = vpack.i.b16 %v1890_v43, %v1856_v45  ;;  %v1905_v54 = vshrl.u32 %v1890_v43, 16 }
 0x233   : > { %v1918_v52 = vpack.i.b16 %v1891_v48, %v1857_v50  ;;  %v1914_v53 = vpack.i.b16 %v1913_v49, %v1912_v51  ;;  %v1921_v58 = vshrl.u32 %v1891_v48, 16 }
 0x234   : > { %v1906_v57 = vpack.i.b16 %v1905_v54, %v1904_v56 }
 0x235   : > { %v1922_v61 = vpack.i.b16 %v1921_v58, %v1920_v59 }
 0x236   : > { %1940 = vxpose.xlu1.c.b16.start.end [1/1] (short) (narrow) %v1898_v46, 16  ;;  %1956 = vxpose.xlu0.c.b16.start.end [1/1] (short) (narrow) %v1902_v47, 16 }
 0x23a   : > { %2020 = vxpose.xlu1.c.b16.start.end [1/1] (short) (narrow) %v1918_v52, 16  ;;  %2004 = vxpose.xlu0.c.b16.start.end [1/1] (short) (narrow) %v1914_v53, 16 }
 0x23b   : > { %v1127_v60 = vpop.permute.xlu1 %1126 }
 0x23c   : > { %v1138_v2 = vcombine.low %v6409_v6, %v1127_v60  ;;  %v1139_v4 = vcombine.high %v6409_v6, %v1127_v60 }
 0x23e   : > { %1972 = vxpose.xlu0.c.b16.start.end [1/1] (short) (narrow) %v1906_v57, 16  ;;  %1464 = vrot.lane.b32.xlu1 %v6437_v55, %s6036_s15  ;;  %v1146_v8 = vrot.slane %v1138_v2, %v6390_v35  ;;  %v1153_v10 = vrot.slane %v1139_v4, %v6390_v35 }
 0x23f   : > { %v1133_v62 = vpop.permute.xlu1 %1132 }
 0x240   : > { %v1121_v63 = vpop.permute.xlu0 %1120 }
 0x241   : > { %v1154_v0 = vcombine.low %v1121_v63, %v1133_v62  ;;  %v1155_v1 = vcombine.high %v1121_v63, %v1133_v62 }
 0x242   : > { %2036 = vxpose.xlu0.c.b16.start.end [1/1] (short) (narrow) %v1922_v61, 16  ;;  %1476 = vrot.lane.b32.xlu1 %v6437_v55, %s6035_s19 }
 0x243   : > { %v1162_v5 = vrot.slane %v1154_v0, %v6390_v35  ;;  %v1169_v7 = vrot.slane %v1155_v1, %v6390_v35 }
 0x245   : > { %v1170_v11 = vcombine.low %v1146_v8, %v1162_v5  ;;  %v1171_v12 = vcombine.high %v1146_v8, %v1162_v5  ;;  %v1186_v13 = vcombine.low %v1153_v10, %v1169_v7  ;;  %v1187_v14 = vcombine.high %v1153_v10, %v1169_v7 }
 0x246   : > { %1294 = vrot.lane.b32.xlu1 %v6377_v17, %s6036_s15 }
 0x247   : > { %v1178_v18 = vrot.slane %v1170_v11, %v6393_v41  ;;  %v1185_v19 = vrot.slane %v1171_v12, %v6393_v41  ;;  %v1194_v6 = vrot.slane %v1186_v13, %v6393_v41  ;;  %v1201_v20 = vrot.slane %v1187_v14, %v6393_v41 }
 0x249   : > { %v1202_v24 = vcombine.high %v1178_v18, %v6033_v3  ;;  %v1203_v25 = vcombine.high %v1185_v19, %v6033_v3  ;;  %v1204_v26 = vcombine.high %v1194_v6, %v6033_v3  ;;  %v1205_v27 = vcombine.high %v1201_v20, %v6033_v3 }
 0x24a   : > { %1306 = vrot.lane.b32.xlu1 %v6377_v17, %s6035_s19  ;;  %v5449_v38 = vpack.c.bf16 %v1194_v6, %v1178_v18  ;;  %v5450_v39 = vpack.c.bf16 %v1201_v20, %v1185_v19 }
 0x24b   : > { %1470 = vrot.lane.b32.xlu0 %v6437_v55, %s6037_s20  ;;  %v5451_v33 = vpack.c.bf16 %v1204_v26, %v1202_v24  ;;  %v5452_v34 = vpack.c.bf16 %v1205_v27, %v1203_v25 }
 0x24c   : > { %v1641_v47 = vrot.slane %v5449_v38, %v6390_v35  ;;  %v1649_v48 = vrot.slane %v5450_v39, %v6390_v35 }
 0x24d   : > { %v1666_v44 = vrot.slane %v5451_v33, %v6390_v35  ;;  %v1674_v45 = vrot.slane %v5452_v34, %v6390_v35 }
 0x24e   : > { %v1650_v56 = vcombine.low %v1641_v47, %v1649_v48 }
 0x24f   : > { %1300 = vrot.lane.b32.xlu0 %v6377_v17, %s6037_s20  ;;  %v1675_v52 = vcombine.low %v1666_v44, %v1674_v45 }
 0x250   : > { %v1657_v62 = vrot.slane %v1650_v56, %v6393_v41 }
 0x251   : > { %v1682_v59 = vrot.slane %v1675_v52, %v6393_v41 }
 0x252   : > { %v1687_v11 = vshrl.u32 %v1657_v62, 16  ;;  %v1658_v20 = vcombine.high %v1657_v62, %v6040_v42 }
 0x253   : > { %v1688_v4 = vshrl.u32 %v1682_v59, 16  ;;  %v1686_v14 = vpack.i.b16 %v1682_v59, %v1657_v62  ;;  %v1683_v6 = vcombine.high %v1682_v59, %v6040_v42 }
 0x254   : > { %v1693_v25 = vshrl.u32 %v1658_v20, 16 }
 0x255   : > { %v1689_v18 = vpack.i.b16 %v1688_v4, %v1687_v11  ;;  %v1692_v24 = vpack.i.b16 %v1683_v6, %v1658_v20 }
 0x294   : > { %v1932_v15 = vpop.trf.xlu0  ;;  %v1996_v16 = vpop.trf.xlu1 }
 0x295   : > { %v2052_v28 = vcombine.low %v1932_v15, %v1996_v16 }
 0x297   : > { %v2059_v36 = vrot.slane %v2052_v28, %v6390_v35 }
 0x298   : > { %v1964_v21 = vpop.trf.xlu0  ;;  %v1948_v22 = vpop.trf.xlu1 }
 0x29c   : > { %v2012_v29 = vpop.trf.xlu0  ;;  %v2028_v30 = vpop.trf.xlu1 }
 0x29d   : > { %v2060_v32 = vcombine.low %v1964_v21, %v2028_v30  ;;  %v2077_v43 = vcombine.low %v1948_v22, %v2012_v29  ;;  %v1694_v22 = vshrl.u32 %v1683_v6, 16 }
 0x29f   : > { %v2067_v37 = vrot.slane %v2060_v32, %v6390_v35  ;;  %v2084_v50 = vrot.slane %v2077_v43, %v6390_v35  ;;  %v1695_v26 = vpack.i.b16 %v1694_v22, %v1693_v25 }
 0x2a0   : > { %v1980_v40 = vpop.trf.xlu0 }
 0x2a1   : > { %v2068_v46 = vcombine.low %v2059_v36, %v2067_v37 }
 0x2a3   : > { %v2075_v53 = vrot.slane %v2068_v46, %v6393_v41 }
 0x2a4   : > { %v2044_v49 = vpop.trf.xlu0 }
 0x2a5   : > { %v2085_v51 = vcombine.low %v1980_v40, %v2044_v49  ;;  %v2076_v58 = vcombine.high %v2075_v53, %v6040_v42  ;;  %v2105_v60 = vshrl.u32 %v2075_v53, 16 }
 0x2a7   : > { %v2092_v54 = vrot.slane %v2085_v51, %v6390_v35  ;;  %v2111_v2 = vshrl.u32 %v2076_v58, 16 }
 0x2a9   : > { %v2093_v57 = vcombine.low %v2084_v50, %v2092_v54 }
 0x2ab   : > { %v2100_v61 = vrot.slane %v2093_v57, %v6393_v41 }
 0x2ad   : > { %v2104_v63 = vpack.i.b16 %v2100_v61, %v2075_v53  ;;  %v2106_v0 = vshrl.u32 %v2100_v61, 16  ;;  %v2101_v1 = vcombine.high %v2100_v61, %v6040_v42 }
 0x2af   : > { %v2120_v5 = vsel %vm2118_vm3, %v2104_v63, 0  ;;  %v2107_v7 = vpack.i.b16 %v2106_v0, %v2105_v60  ;;  %v2110_v8 = vpack.i.b16 %v2101_v1, %v2076_v58  ;;  %v2112_v10 = vshrl.u32 %v2101_v1, 16 }
 0x2b0   : > { %5583 = vmatpush3.bf16.msra.mxu1 %v2120_v5  ;;  %v1465_v12 = vpop.permute.xlu1 %1464 }
 0x2b1   : > { %v2166_v13 = vsel %vm2118_vm3, %v2107_v7, 0  ;;  %5594 = vmatprep.subr.bf16.mxu1 %v6033_v3  ;;  %v2212_v15 = vsel %vm2118_vm3, %v2110_v8, 0  ;;  %v2113_v16 = vpack.i.b16 %v2112_v10, %v2111_v2 }
 0x2b2   : > { %5589 = vmatpush3.bf16.msra.mxu0 %v2166_v13 }
 0x2b3   : > { %5585 = vmatmul.mubr.msk.bf16.vlgmr.msra.gmra.mxu1 %vm2114_vm4, %v1686_v14  ;;  %5600 = vmatprep.subr.bf16.mxu0 %v6033_v3  ;;  %v2258_v19 = vsel %vm2118_vm3, %v2113_v16, 0 }
 0x2b4   : > { %5595 = vmatpush3.bf16.msra.mxu1 %v2212_v15  ;;  %5596 = vmatprep.mubr.msk.bf16.mxu1 %vm6034_vm1, %v6033_v3  ;;  %v1477_v21 = vpop.permute.xlu1 %1476 }
 0x2b5   : > { %5591 = vmatmul.mubr.msk.bf16.vlgmr.msra.gmra.mxu0 %vm2114_vm4, %v1689_v18  ;;  %5606 = vmatprep.subr.bf16.mxu1 %v6033_v3  ;;  %v1498_v27 = vcombine.low %v1465_v12, %v1477_v21  ;;  %v1499_v30 = vcombine.high %v1465_v12, %v1477_v21 }
 0x2b6   : > { %5601 = vmatpush3.bf16.msra.mxu0 %v2258_v19  ;;  %5602 = vmatprep.mubr.msk.bf16.mxu0 %vm6034_vm1, %v6033_v3 }
 0x2b7   : > { %5612 = vmatprep.subr.bf16.mxu0 %v6033_v3  ;;  %v1506_v34 = vrot.slane %v1498_v27, %v6390_v35  ;;  %v1513_v39 = vrot.slane %v1499_v30, %v6390_v35 }
 0x2b8   : > { %v1295_v28 = vpop.permute.xlu1 %1294 }
 0x2bb   : > { %5597 = vmatmul.mubr.msk.bf16.vlgmr.msra.gmra.mxu1 %vm2114_vm4, %v1692_v24 }
 0x2bc   : > { %5608 = vmatprep.mubr.msk.bf16.mxu1 %vm6034_vm1, %v6033_v3  ;;  %v1307_v44 = vpop.permute.xlu1 %1306 }
 0x2bd   : > { %5603 = vmatmul.mubr.msk.bf16.vlgmr.msra.gmra.mxu0 %vm2114_vm4, %v1695_v26  ;;  %v1471_v29 = vpop.permute.xlu0 %1470  ;;  %v1394_v47 = vcombine.low %v1295_v28, %v1307_v44  ;;  %v1395_v63 = vcombine.high %v1295_v28, %v1307_v44 }
 0x2be   : > { %v1482_v32 = vcombine.low %v6437_v55, %v1471_v29  ;;  %v1483_v33 = vcombine.high %v6437_v55, %v1471_v29  ;;  %5614 = vmatprep.mubr.msk.bf16.mxu0 %vm6034_vm1, %v6033_v3 }
 0x2bf   : > { %v1402_v56 = vrot.slane %v1394_v47, %v6390_v35  ;;  %v1409_v8 = vrot.slane %v1395_v63, %v6390_v35 }
 0x2c0   : > { %v1490_v36 = vrot.slane %v1482_v32, %v6390_v35  ;;  %v1497_v37 = vrot.slane %v1483_v33, %v6390_v35 }
 0x2c1   : > { %v1301_v38 = vpop.permute.xlu0 %1300 }
 0x2c2   : > { %v1514_v40 = vcombine.low %v1490_v36, %v1506_v34  ;;  %v1515_v43 = vcombine.high %v1490_v36, %v1506_v34  ;;  %v1378_v45 = vcombine.low %v6377_v17, %v1301_v38  ;;  %v1530_v55 = vcombine.low %v1497_v37, %v1513_v39 }
 0x2c3   : > { %v1531_v54 = vcombine.high %v1497_v37, %v1513_v39  ;;  %v1379_v59 = vcombine.high %v6377_v17, %v1301_v38 }
 0x2c4   : > { %v1522_v46 = vrot.slane %v1514_v40, %v6393_v41  ;;  %v1529_v50 = vrot.slane %v1515_v43, %v6393_v41  ;;  %v1386_v51 = vrot.slane %v1378_v45, %v6390_v35  ;;  %v1538_v53 = vrot.slane %v1530_v55, %v6393_v41 }
 0x2c5   : > { %v1545_v60 = vrot.slane %v1531_v54, %v6393_v41  ;;  %v1393_v2 = vrot.slane %v1379_v59, %v6390_v35 }
 0x2c6   : > { %v1618_v48 = vpack.c.bf16 %v1522_v46, %v1522_v46  ;;  %v1546_v49 = vcombine.high %v1522_v46, %v6033_v3  ;;  %v1620_v57 = vpack.c.bf16 %v1529_v50, %v1529_v50  ;;  %v1547_v58 = vcombine.high %v1529_v50, %v6033_v3 }
 0x2c7   : > { %v1622_v61 = vpack.c.bf16 %v1538_v53, %v1538_v53  ;;  %v1410_v62 = vcombine.low %v1386_v51, %v1402_v56  ;;  %v1548_v1 = vcombine.high %v1538_v53, %v6033_v3  ;;  %v1624_v4 = vpack.c.bf16 %v1545_v60, %v1545_v60 }
 0x2c8   : > { %2353 = vxpose.xlu0.c.b16.start.end [1/1] (short) (narrow) %v1618_v48, 16  ;;  %v1619_v52 = vpack.c.bf16 %v1546_v49, %v1546_v49  ;;  %v1621_v0 = vpack.c.bf16 %v1547_v58, %v1547_v58  ;;  %v1411_v7 = vcombine.high %v1386_v51, %v1402_v56  ;;  %v1549_v10 = vcombine.high %v1545_v60, %v6033_v3 }
 0x2c9   : > { %v1418_v5 = vrot.slane %v1410_v62, %v6393_v41  ;;  %v1623_v17 = vpack.c.bf16 %v1548_v1, %v1548_v1  ;;  %v1426_v13 = vcombine.low %v1393_v2, %v1409_v8  ;;  %v1427_v19 = vcombine.high %v1393_v2, %v1409_v8 }
 0x2ca   : > { %2369 = vxpose.xlu1.c.b16.start.end [1/1] (short) (narrow) %v1619_v52, 16  ;;  %v1425_v12 = vrot.slane %v1411_v7, %v6393_v41  ;;  %v1625_v14 = vpack.c.bf16 %v1549_v10, %v1549_v10 }
 0x2cb   : > { %v1454_v11 = vpack.c.bf16 %v1418_v5, %v1418_v5  ;;  %v1442_v15 = vcombine.high %v1418_v5, %v6033_v3  ;;  %v1434_v18 = vrot.slane %v1426_v13, %v6393_v41  ;;  %v1441_v22 = vrot.slane %v1427_v19, %v6393_v41 }
 0x2cc   : > { %2385 = vxpose.xlu0.c.b16.start.end [1/1] (short) (narrow) %v1620_v57, 16  ;;  %v1456_v16 = vpack.c.bf16 %v1425_v12, %v1425_v12  ;;  %v1443_v20 = vcombine.high %v1425_v12, %v6033_v3 }
 0x2cd   : > { %v1455_v6 = vpack.c.bf16 %v1442_v15, %v1442_v15  ;;  %v1458_v21 = vpack.c.bf16 %v1434_v18, %v1434_v18  ;;  %v1444_v25 = vcombine.high %v1434_v18, %v6033_v3  ;;  %v1460_v26 = vpack.c.bf16 %v1441_v22, %v1441_v22 }
 0x2ce   : > { %2417 = vxpose.xlu1.c.b16.start.end [1/1] (short) (narrow) %v1622_v61, 16  ;;  %v1457_v24 = vpack.c.bf16 %v1443_v20, %v1443_v20  ;;  %v1445_v28 = vcombine.high %v1441_v22, %v6033_v3 }
 0x2cf   : > { %v1459_v27 = vpack.c.bf16 %v1444_v25, %v1444_v25 }
 0x2d0   : > { %2401 = vxpose.xlu0.c.b16.start.end [1/1] (short) (narrow) %v1621_v0, 16  ;;  %v1461_v29 = vpack.c.bf16 %v1445_v28, %v1445_v28 }
 0x2d2   : > { %2449 = vxpose.xlu1.c.b16.start.end [1/1] (short) (narrow) %v1624_v4, 16 }
 0x2d4   : > { %2433 = vxpose.xlu0.c.b16.start.end [1/1] (short) (narrow) %v1623_v17, 16 }
 0x2d6   : > { %3298 = vxpose.xlu1.c.b16.start.end [1/1] (short) (narrow) %v1454_v11, 16 }
 0x2d8   : > { %2465 = vxpose.xlu0.c.b16.start.end [1/1] (short) (narrow) %v1625_v14, 16 }
 0x2da   : > { %3330 = vxpose.xlu1.c.b16.start.end [1/1] (short) (narrow) %v1456_v16, 16 }
 0x2dc   : > { %3314 = vxpose.xlu0.c.b16.start.end [1/1] (short) (narrow) %v1455_v6, 16 }
 0x2de   : > { %3362 = vxpose.xlu1.c.b16.start.end [1/1] (short) (narrow) %v1458_v21, 16 }
 0x2e0   : > { %3346 = vxpose.xlu0.c.b16.start.end [1/1] (short) (narrow) %v1457_v24, 16 }
 0x2e2   : > { %3394 = vxpose.xlu1.c.b16.start.end [1/1] (short) (narrow) %v1460_v26, 16 }
 0x2e4   : > { %3378 = vxpose.xlu0.c.b16.start.end [1/1] (short) (narrow) %v1459_v27, 16 }
 0x2e6   : > { %1122 = vrot.lane.b32.xlu1 %v6385_v23, %s6036_s15 }
 0x2e8   : > { %3410 = vxpose.xlu0.c.b16.start.end [1/1] (short) (narrow) %v1461_v29, 16 }
 0x2ea   : > { %1134 = vrot.lane.b32.xlu1 %v6385_v23, %s6035_s19 }
 0x2f1   : > { %1128 = vrot.lane.b32.xlu0 %v6385_v23, %s6037_s20 }
 0x32a   : > { %v2361_v30 = vpop.trf.xlu0 }
 0x32c   : > { %v2377_v32 = vpop.trf.xlu1 }
 0x32e   : > { %v2393_v33 = vpop.trf.xlu0 }
 0x330   : > { %v2425_v34 = vpop.trf.xlu1 }
 0x331   : > { %v2481_v59 = vcombine.low %v2361_v30, %v2425_v34 }
 0x332   : > { %v2409_v36 = vpop.trf.xlu0 }
 0x333   : > { %v2488_v4 = vrot.slane %v2481_v59, %v6390_v35 }
 0x334   : > { %v2457_v37 = vpop.trf.xlu1 }
 0x335   : > { %v2489_v53 = vcombine.low %v2393_v33, %v2457_v37 }
 0x336   : > { %v2441_v38 = vpop.trf.xlu0 }
 0x337   : > { %v2515_v52 = vcombine.low %v2377_v32, %v2441_v38  ;;  %v2496_v63 = vrot.slane %v2489_v53, %v6390_v35 }
 0x338   : > { %v3306_v39 = vpop.trf.xlu1 }
 0x339   : > { %v2522_v62 = vrot.slane %v2515_v52, %v6390_v35  ;;  %v2497_v17 = vcombine.low %v2488_v4, %v2496_v63  ;;  %v2498_v10 = vcombine.high %v2488_v4, %v2496_v63 }
 0x33a   : > { %v2473_v40 = vpop.trf.xlu0 }
 0x33b   : > { %v2523_v49 = vcombine.low %v2409_v36, %v2473_v40  ;;  %v2512_v19 = vrot.slane %v2498_v10, %v6393_v41  ;;  %v2505_v6 = vrot.slane %v2497_v17, %v6393_v41 }
 0x33c   : > { %v3338_v43 = vpop.trf.xlu1 }
 0x33d   : > { %v2530_v57 = vrot.slane %v2523_v49, %v6390_v35  ;;  %v2553_v24 = vshrl.u32 %v2505_v6, 16  ;;  %v2569_v28 = vshrl.u32 %v2512_v19, 16  ;;  %v2513_v29 = vcombine.high %v2505_v6, %v6040_v42 }
 0x33e   : > { %v3322_v44 = vpop.trf.xlu0  ;;  %v2514_v37 = vcombine.high %v2512_v19, %v6040_v42 }
 0x33f   : > { %v2532_v2 = vcombine.high %v2522_v62, %v2530_v57  ;;  %v2531_v5 = vcombine.low %v2522_v62, %v2530_v57  ;;  %v2561_v36 = vshrl.u32 %v2513_v29, 16 }
 0x340   : > { %v3370_v45 = vpop.trf.xlu1 }
 0x341   : > { %v3426_v47 = vcombine.low %v3306_v39, %v3370_v45  ;;  %v2546_v12 = vrot.slane %v2532_v2, %v6393_v41  ;;  %v2539_v16 = vrot.slane %v2531_v5, %v6393_v41 }
 0x342   : > { %v3354_v46 = vpop.trf.xlu0 }
 0x343   : > { %v6539_v54 = vrot.slane %v3426_v47, %v6390_v35  ;;  %v2567_v20 = vpack.i.b16 %v2546_v12, %v2512_v19  ;;  %v2554_v21 = vshrl.u32 %v2539_v16, 16  ;;  %v2551_v22 = vpack.i.b16 %v2539_v16, %v2505_v6  ;;  %v915_v47 = vld [vmem:[%s6960_s4] sm:$0x1] }
 0x344   : > { %v3402_v55 = vpop.trf.xlu1  ;;  %v2570_v25 = vshrl.u32 %v2546_v12, 16  ;;  %v2547_v26 = vcombine.high %v2539_v16, %v6040_v42  ;;  %v2548_v33 = vcombine.high %v2546_v12, %v6040_v42  ;;  %vm2304_vm5 = vcmp.eq.bf16.partialorder %v915_v47, 0 }
 0x345   : > { %v3434_v48 = vcombine.low %v3338_v43, %v3402_v55  ;;  %v2555_v27 = vpack.i.b16 %v2554_v21, %v2553_v24 }
 0x346   : > { %v3386_v50 = vpop.trf.xlu0  ;;  %v2571_v30 = vpack.i.b16 %v2570_v25, %v2569_v28  ;;  %v2562_v32 = vshrl.u32 %v2547_v26, 16  ;;  %v2559_v34 = vpack.i.b16 %v2547_v26, %v2513_v29  ;;  %v2578_v40 = vshrl.u32 %v2548_v33, 16 }
 0x347   : > { %v6536_v51 = vrot.slane %v3434_v48, %v6390_v35  ;;  %v3460_v56 = vcombine.low %v3322_v44, %v3386_v50  ;;  %v2575_v45 = vpack.i.b16 %v2548_v33, %v2514_v37 }
 0x348   : > { %v2563_v39 = vpack.i.b16 %v2562_v32, %v2561_v36 }
 0x349   : > { %v3442_v61 = vcombine.low %v6539_v54, %v6536_v51  ;;  %v3467_v0 = vrot.slane %v3460_v56, %v6390_v35  ;;  %v3443_v44 = vcombine.high %v6539_v54, %v6536_v51 }
 0x34a   : > { %v3418_v58 = vpop.trf.xlu0 }
 0x34b   : > { %v3468_v60 = vcombine.low %v3354_v46, %v3418_v58  ;;  %v3450_v7 = vrot.slane %v3442_v61, %v6393_v41  ;;  %v2577_v46 = vshrl.u32 %v2514_v37, 16  ;;  %v3457_v56 = vrot.slane %v3443_v44, %v6393_v41 }
 0x34c   : > { %v2305_v58 = vsel %vm2304_vm5, 65537, %v6040_v42 }
 0x34d   : > { %v3475_v1 = vrot.slane %v3468_v60, %v6390_v35  ;;  %v3498_v14 = vshrl.u32 %v3450_v7, 16  ;;  %v3458_v55 = vcombine.high %v3450_v7, %v6040_v42  ;;  %v2579_v48 = vpack.i.b16 %v2578_v40, %v2577_v46 }
 0x34e   : > { %v3514_v61 = vshrl.u32 %v3457_v56, 16  ;;  %v3459_v60 = vcombine.high %v3457_v56, %v6040_v42  ;;  %v2306_v63 = vunpack.c.l.b16 %v2305_v58 }
 0x34f   : > { %v3476_v8 = vcombine.low %v3467_v0, %v3475_v1  ;;  %v3477_v38 = vcombine.high %v3467_v0, %v3475_v1  ;;  %v3506_v53 = vshrl.u32 %v3458_v55, 16 }
 0x350   : > { %v3522_v2 = vshrl.u32 %v3459_v60, 16  ;;  %vm2307_vm6 = vcmp.ne.s32.totalorder %v2306_v63, 0 }
 0x351   : > { %v3484_v11 = vrot.slane %v3476_v8, %v6393_v41  ;;  %v3491_v50 = vrot.slane %v3477_v38, %v6393_v41  ;;  %v2308_v8 = vsel %vm2307_vm6, 1, %v6040_v42 }
 0x353   : > { %v3496_v13 = vpack.i.b16 %v3484_v11, %v3450_v7  ;;  %v3499_v15 = vshrl.u32 %v3484_v11, 16  ;;  %v3492_v43 = vcombine.high %v3484_v11, %v6040_v42  ;;  %v3515_v54 = vshrl.u32 %v3491_v50, 16 }
 0x354   : > { %v3493_v57 = vcombine.high %v3491_v50, %v6040_v42  ;;  %v3512_v59 = vpack.i.b16 %v3491_v50, %v3457_v56  ;;  %v2311_v7 = vsub.s32 0, %v6387_v31 }
 0x355   : > { %3526 = vxpose.xlu0.c.b16.start.end [1/1] (short) (narrow) %v3496_v13, 16  ;;  %v3500_v18 = vpack.i.b16 %v3499_v15, %v3498_v14  ;;  %v3507_v49 = vshrl.u32 %v3492_v43, 16  ;;  %v3504_v52 = vpack.i.b16 %v3492_v43, %v3458_v55  ;;  %v3516_v62 = vpack.i.b16 %v3515_v54, %v3514_v61 }
 0x356   : > { %v3523_v0 = vshrl.u32 %v3493_v57, 16  ;;  %v3520_v1 = vpack.i.b16 %v3493_v57, %v3459_v60  ;;  %v2312_v11 = vrot.slane %v2308_v8, %v2311_v7 }
 0x357   : > { %3542 = vxpose.xlu1.c.b16.start.end [1/1] (short) (narrow) %v3500_v18, 16  ;;  %v3508_v51 = vpack.i.b16 %v3507_v49, %v3506_v53 }
 0x358   : > { %v3524_v4 = vpack.i.b16 %v3523_v0, %v3522_v2  ;;  %vm2313_vm7 = vcmp.eq.s32.totalorder %v2312_v11, 1 }
 0x359   : > { %2645 = vxpose.xlu0.c.b16.start.end [1/1] (short) (narrow) %v2567_v20, 16 }
 0x35b   : > { %2581 = vxpose.xlu1.c.b16.start.end [1/1] (short) (narrow) %v2551_v22, 16 }
 0x35d   : > { %2597 = vxpose.xlu0.c.b16.start.end [1/1] (short) (narrow) %v2555_v27, 16 }
 0x35f   : > { %2661 = vxpose.xlu1.c.b16.start.end [1/1] (short) (narrow) %v2571_v30, 16 }
 0x361   : > { %2613 = vxpose.xlu0.c.b16.start.end [1/1] (short) (narrow) %v2559_v34, 16 }
 0x363   : > { %2629 = vxpose.xlu1.c.b16.start.end [1/1] (short) (narrow) %v2563_v39, 16  ;;  %v1129_v11 = vpop.permute.xlu0 %1128 }
 0x365   : > { %2677 = vxpose.xlu0.c.b16.start.end [1/1] (short) (narrow) %v2575_v45, 16 }
 0x367   : > { %2693 = vxpose.xlu1.c.b16.start.end [1/1] (short) (narrow) %v2579_v48, 16 }
 0x369   : > { %3558 = vxpose.xlu0.c.b16.start.end [1/1] (short) (narrow) %v3504_v52, 16 }
 0x36b   : > { %3574 = vxpose.xlu1.c.b16.start.end [1/1] (short) (narrow) %v3508_v51, 16 }
 0x36d   : > { %3590 = vxpose.xlu0.c.b16.start.end [1/1] (short) (narrow) %v3512_v59, 16 }
 0x36f   : > { %3606 = vxpose.xlu1.c.b16.start.end [1/1] (short) (narrow) %v3516_v62, 16 }
 0x371   : > { %3622 = vxpose.xlu0.c.b16.start.end [1/1] (short) (narrow) %v3520_v1, 16 }
 0x373   : > { %v2156_v5 = vpop.f32.mrf.mxu1  ;;  %3638 = vxpose.xlu1.c.b16.start.end [1/1] (short) (narrow) %v3524_v4, 16  ;;  %v1123_v4 = vpop.permute.xlu1 %1122 }
 0x374   : > { %v2300_v18 = vmul.f32 0.35355338, %v2156_v5 }
 0x375   : > { %v5586_v17 = vpop.f32.mrf.mxu1  ;;  %v2202_v10 = vpop.f32.mrf.mxu0 }
 0x376   : > { %v2301_v14 = vmul.f32 0.35355338, %v2202_v10  ;;  %v2314_v25 = vsel %vm2313_vm7, -1e+10, %v2300_v18  ;;  %v1207_v18 = vcombine.high %v6385_v23, %v1129_v11 }
 0x377   : > { %v2159_v12 = vpop.f32.mrf.mxu1  ;;  %1472 = vrot.lane.b32.xlu1 %v6416_v9, %s6037_s20  ;;  %v5592_v13 = vpop.f32.mrf.mxu0  ;;  %v2318_v33 = vsel %vm2114_vm4, %v2314_v25, -inf  ;;  %s6043_s20 = smov 24  }
 0x378   : > { %v2315_v20 = vsel %vm2313_vm7, -1e+10, %v2301_v14  ;;  %v1135_v12 = vpop.permute.xlu1 %1134  ;;  %v1206_v14 = vcombine.low %v6385_v23, %v1129_v11 }
 0x379   : > { %v5587_v15 = vpop.f32.mrf.mxu1  ;;  %v2205_v16 = vpop.f32.mrf.mxu0  ;;  %v2319_v28 = vsel %vm2114_vm4, %v2315_v20, -inf }
 0x37a   : > { %1466 = vrot.lane.b32.xlu0 %v6416_v9, %s6036_s15  ;;  %v2322_v39 = vmax.f32 %v2318_v33, %v2319_v28  ;;  %v1222_v16 = vcombine.low %v1123_v4, %v1135_v12  ;;  %s6042_s15 = smov 8  }
 0x37b   : > { %v2248_v19 = vpop.f32.mrf.mxu1  ;;  %1478 = vrot.lane.b32.xlu1 %v6416_v9, %s6035_s19  ;;  %v5593_v6 = vpop.f32.mrf.mxu0  ;;  %s6041_s19 = smov 16  }
 0x37c   : > { %v2302_v21 = vmul.f32 0.35355338, %v2248_v19  ;;  %v1223_v6 = vcombine.high %v1123_v4, %v1135_v12 }
 0x37d   : > { %v5598_v22 = vpop.f32.mrf.mxu1  ;;  %v2294_v24 = vpop.f32.mrf.mxu0 }
 0x37e   : > { %v2316_v26 = vsel %vm2313_vm7, -1e+10, %v2302_v21  ;;  %v2303_v27 = vmul.f32 0.35355338, %v2294_v24  ;;  %v1230_v22 = vrot.slane %v1222_v16, %v6390_v35  ;;  %v1221_v24 = vrot.slane %v1207_v18, %v6390_v35 }
 0x37f   : > { %v2251_v29 = vpop.f32.mrf.mxu1  ;;  %v5604_v30 = vpop.f32.mrf.mxu0  ;;  %v2320_v34 = vsel %vm2114_vm4, %v2316_v26, -inf }
 0x380   : > { %v2317_v32 = vsel %vm2313_vm7, -1e+10, %v2303_v27 }
 0x381   : > { %v2321_v36 = vsel %vm2114_vm4, %v2317_v32, -inf  ;;  %v5599_v37 = vpop.f32.mrf.mxu1  ;;  %v2297_v38 = vpop.f32.mrf.mxu0 }
 0x382   : > { %v2323_v40 = vmax.f32 %v2320_v34, %v2321_v36 }
 0x383   : > { %v5605_v43 = vpop.f32.mrf.mxu0 }
 0x384   : > { %v2324_v44 = vmax.f32 %v2322_v39, %v2323_v40 }
 0x386   : > { %v2325_v45 = vsub.f32 %v2314_v25, %v2324_v44  ;;  %v2326_v46 = vsub.f32 %v2315_v20, %v2324_v44  ;;  %v2327_v55 = vsub.f32 %v2316_v26, %v2324_v44  ;;  %v2328_v47 = vsub.f32 %v2317_v32, %v2324_v44 }
 0x387   : > { %v1214_v20 = vrot.slane %v1206_v14, %v6390_v35  ;;  %v1237_v26 = vrot.slane %v1223_v6, %v6390_v35 }
 0x388   : > { %v2329_v48 = vmul.f32 1.442695, %v2325_v45  ;;  %v2331_v49 = vmul.f32 1.442695, %v2326_v46  ;;  %v2333_v50 = vmul.f32 1.442695, %v2327_v55 }
 0x389   : > { %v2335_v52 = vmul.f32 1.442695, %v2328_v47  ;;  %v1238_v27 = vcombine.low %v1214_v20, %v1230_v22  ;;  %v1239_v29 = vcombine.high %v1214_v20, %v1230_v22  ;;  %v1254_v30 = vcombine.low %v1221_v24, %v1237_v26 }
 0x38a   : > { %5830 = vpow2.f32 %v2329_v48  ;;  %v1255_v32 = vcombine.high %v1221_v24, %v1237_v26 }
 0x38b   : > { %5832 = vpow2.f32 %v2331_v49  ;;  %v1246_v23 = vrot.slane %v1238_v27, %v6393_v41  ;;  %v1253_v38 = vrot.slane %v1239_v29, %v6393_v41  ;;  %v1262_v39 = vrot.slane %v1254_v30, %v6393_v41 }
 0x38c   : > { %5834 = vpow2.f32 %v2333_v50  ;;  %v1269_v40 = vrot.slane %v1255_v32, %v6393_v41 }
 0x38d   : > { %5836 = vpow2.f32 %v2335_v52  ;;  %v1270_v45 = vcombine.high %v1246_v23, %v6033_v3  ;;  %v1271_v50 = vcombine.high %v1253_v38, %v6033_v3  ;;  %v1272_v52 = vcombine.high %v1262_v39, %v6033_v3 }
 0x397   : > { %v5831_v53 = vpop.eup %5830 }
 0x398   : > { %v5833_v56 = vpop.eup %5832  ;;  %v2337_v51 = vsel %vm2114_vm4, %v5831_v53, 0.0 }
 0x399   : > { %v5835_v54 = vpop.eup %5834  ;;  %v2338_v57 = vsel %vm2114_vm4, %v5833_v56, 0.0 }
 0x39a   : > { %v6587_v58 = vpop.eup %5836  ;;  %v2339_v59 = vadd.f32 %v2338_v57, %v2337_v51  ;;  %v2340_v61 = vsel %vm2114_vm4, %v5835_v54, 0.0 }
 0x39b   : > { %v2342_v62 = vsel %vm2114_vm4, %v6587_v58, 0.0 }
 0x39c   : > { %v2341_v60 = vadd.f32 %v2340_v61, %v2339_v59 }
 0x39e   : > { %v2343_v63 = vadd.f32 %v2342_v62, %v2341_v60 }
 0x3a0   : > { %5838 = vrcp.f32 %v2343_v63 }
 0x3ad   : > { %v5839_v0 = vpop.eup %5838 }
 0x3ae   : > { %v2345_v1 = vmul.f32 %v5839_v0, %v5831_v53  ;;  %v2346_v2 = vmul.f32 %v5839_v0, %v5833_v56  ;;  %v1273_v53 = vcombine.high %v1269_v40, %v6033_v3  ;;  %v2347_v51 = vmul.f32 %v5839_v0, %v5835_v54 }
 0x3af   : > { %v2348_v60 = vmul.f32 %v5839_v0, %v6587_v58 }
 0x3b0   : > { %v2349_v5 = vpack.c.bf16 %v2345_v1, %v2345_v1  ;;  %v2350_v8 = vpack.c.bf16 %v2346_v2, %v2346_v2  ;;  %v5465_v1 = vpack.c.bf16 %v1272_v52, %v1270_v45  ;;  %v5466_v2 = vpack.c.bf16 %v1273_v53, %v1271_v50 }
 0x3b1   : > { %v2352_v12 = vpack.c.bf16 %v2348_v60, %v2348_v60 }
 0x3b2   : > { %v2775_v17 = vsel %vm2114_vm4, %v2349_v5, 0  ;;  %v2821_v10 = vsel %vm2114_vm4, %v2350_v8, 0  ;;  %v2351_v5 = vpack.c.bf16 %v2347_v51, %v2347_v51  ;;  %v3268_v58 = vrot.slane %v5465_v1, %v6390_v35 }
 0x3b3   : > { %5607 = vmatpush3.bf16.xpose.msra.mxu1 %v2775_v17  ;;  %5613 = vmatpush3.bf16.xpose.msra.mxu0 %v2821_v10  ;;  %v5463_v17 = vpack.c.bf16 %v1262_v39, %v1246_v23  ;;  %v5464_v10 = vpack.c.bf16 %v1269_v40, %v1253_v38  ;;  %v3276_v0 = vrot.slane %v5466_v2, %v6390_v35  ;;  %v2913_v30 = vsel %vm2114_vm4, %v2352_v12, 0 }
 0x3b4   : > { %5618 = vmatprep.subr.bf16.mxu1 %v6033_v3  ;;  %5624 = vmatprep.subr.bf16.mxu0 %v6033_v3  ;;  %v2867_v6 = vsel %vm2114_vm4, %v2351_v5, 0 }
 0x3b5   : > { %v3251_v26 = vrot.slane %v5464_v10, %v6390_v35  ;;  %v3277_v32 = vcombine.low %v3268_v58, %v3276_v0 }
 0x3b7   : > { %v6596_v13 = vpop.trf.xlu0 }
 0x3b9   : > { %v6599_v15 = vpop.trf.xlu1 }
 0x3bb   : > { %v2653_v19 = vpop.trf.xlu0 }
 0x3bd   : > { %v2589_v21 = vpop.trf.xlu1 }
 0x3be   : > { %v2709_v36 = vcombine.low %v2589_v21, %v2653_v19 }
 0x3bf   : > { %v2605_v25 = vpop.trf.xlu0 }
 0x3c0   : > { %v2716_v55 = vrot.slane %v2709_v36, %v6390_v35 }
 0x3c1   : > { %v2669_v28 = vpop.trf.xlu1 }
 0x3c2   : > { %v2734_v37 = vcombine.low %v2605_v25, %v2669_v28  ;;  %v3243_v25 = vrot.slane %v5463_v17, %v6390_v35 }
 0x3c3   : > { %v2621_v33 = vpop.trf.xlu0 }
 0x3c4   : > { %v2741_v47 = vrot.slane %v2734_v37, %v6390_v35  ;;  %v3252_v37 = vcombine.low %v3243_v25, %v3251_v26 }
 0x3c5   : > { %v2637_v34 = vpop.trf.xlu1 }
 0x3c7   : > { %v2685_v43 = vpop.trf.xlu0 }
 0x3c8   : > { %v2717_v44 = vcombine.low %v2621_v33, %v2685_v43 }
 0x3c9   : > { %v2701_v46 = vpop.trf.xlu1 }
 0x3ca   : > { %v2724_v48 = vrot.slane %v2717_v44, %v6390_v35  ;;  %v2742_v49 = vcombine.low %v2637_v34, %v2701_v46  ;;  %v3284_v44 = vrot.slane %v3277_v32, %v6393_v41 }
 0x3cb   : > { %v3566_v56 = vpop.trf.xlu0 }
 0x3cc   : > { %v2725_v57 = vcombine.low %v2716_v55, %v2724_v48  ;;  %v2749_v59 = vrot.slane %v2742_v49, %v6390_v35  ;;  %v3290_v53 = vshrl.u32 %v3284_v44, 16  ;;  %v3285_v5 = vcombine.high %v3284_v44, %v6040_v42 }
 0x3cd   : > { %v3582_v61 = vpop.trf.xlu1 }
 0x3ce   : > { %v2732_v62 = vrot.slane %v2725_v57, %v6393_v41  ;;  %v2750_v63 = vcombine.low %v2741_v47, %v2749_v59  ;;  %v3259_v47 = vrot.slane %v3252_v37, %v6393_v41  ;;  %v3296_v10 = vshrl.u32 %v3285_v5, 16 }
 0x3cf   : > { %v3598_v4 = vpop.trf.xlu0 }
 0x3d0   : > { %v2757_v8 = vrot.slane %v2750_v63, %v6393_v41  ;;  %v2762_v54 = vshrl.u32 %v2732_v62, 16  ;;  %v3654_v18 = vcombine.low %v6596_v13, %v3598_v4  ;;  %v2733_v13 = vcombine.high %v2732_v62, %v6040_v42 }
 0x3d1   : > { %v3614_v11 = vpop.trf.xlu1  ;;  %v3289_v63 = vshrl.u32 %v3259_v47, 16  ;;  %v3260_v17 = vcombine.high %v3259_v47, %v6040_v42 }
 0x3d2   : > { %v2761_v14 = vpack.i.b16 %v2757_v8, %v2732_v62  ;;  %v2763_v16 = vshrl.u32 %v2757_v8, 16  ;;  %v2758_v20 = vcombine.high %v2757_v8, %v6040_v42  ;;  %v3679_v21 = vcombine.low %v6599_v15, %v3614_v11 }
 0x3d3   : > { %v3630_v19 = vpop.trf.xlu0  ;;  %v3661_v28 = vrot.slane %v3654_v18, %v6390_v35  ;;  %v2768_v38 = vshrl.u32 %v2733_v13, 16  ;;  %v3288_v62 = vpack.i.b16 %v3284_v44, %v3259_v47  ;;  %v3291_v4 = vpack.i.b16 %v3290_v53, %v3289_v63 }
 0x3d4   : > { %v3662_v22 = vcombine.low %v3566_v56, %v3630_v19  ;;  %5609 = vmatmul.mubr.msk.bf16.vlgmr.msra.gmra.mxu1 %vm2114_vm4, %v2761_v14  ;;  %v2764_v24 = vpack.i.b16 %v2763_v16, %v2762_v54  ;;  %v2769_v33 = vshrl.u32 %v2758_v20, 16  ;;  %v3686_v23 = vrot.slane %v3679_v21, %v6390_v35 }
 0x3d5   : > { %5619 = vmatpush3.bf16.xpose.msra.mxu1 %v2867_v6  ;;  %v3646_v27 = vpop.trf.xlu1  ;;  %5620 = vmatprep.mubr.msk.bf16.mxu1 %vm6034_vm1, %v6033_v3  ;;  %v2767_v43 = vpack.i.b16 %v2758_v20, %v2733_v13  ;;  %v3294_v12 = vpack.i.b16 %v3285_v5, %v3260_v17  ;;  %v3295_v54 = vshrl.u32 %v3260_v17, 16 }
 0x3d6   : > { %v3669_v29 = vrot.slane %v3662_v22, %v6390_v35  ;;  %v3687_v15 = vcombine.low %v3582_v61, %v3646_v27  ;;  %5615 = vmatmul.mubr.msk.bf16.vlgmr.msra.gmra.mxu0 %vm2114_vm4, %v2764_v24  ;;  %5630 = vmatprep.subr.bf16.mxu1 %v6033_v3  ;;  %v2770_v46 = vpack.i.b16 %v2769_v33, %v2768_v38 }
 0x3d7   : > { %5625 = vmatpush3.bf16.xpose.msra.mxu0 %v2913_v30  ;;  %5626 = vmatprep.mubr.msk.bf16.mxu0 %vm6034_vm1, %v6033_v3  ;;  %v3297_v18 = vpack.i.b16 %v3296_v10, %v3295_v54 }
 0x3d8   : > { %v3670_v34 = vcombine.low %v3661_v28, %v3669_v29  ;;  %v3694_v36 = vrot.slane %v3687_v15, %v6390_v35  ;;  %5636 = vmatprep.subr.bf16.mxu0 %v6033_v3 }
 0x3da   : > { %v3677_v39 = vrot.slane %v3670_v34, %v6393_v41  ;;  %v3695_v40 = vcombine.low %v3686_v23, %v3694_v36 }
 0x3dc   : > { %v3702_v45 = vrot.slane %v3695_v40, %v6393_v41  ;;  %5621 = vmatmul.mubr.msk.bf16.vlgmr.msra.gmra.mxu1 %vm2114_vm4, %v2767_v43  ;;  %v3678_v55 = vcombine.high %v3677_v39, %v6040_v42  ;;  %v3707_v49 = vshrl.u32 %v3677_v39, 16 }
 0x3dd   : > { %5632 = vmatprep.mubr.msk.bf16.mxu1 %vm6034_vm1, %v6033_v3 }
 0x3de   : > { %5627 = vmatmul.mubr.msk.bf16.vlgmr.msra.gmra.mxu0 %vm2114_vm4, %v2770_v46  ;;  %v3706_v48 = vpack.i.b16 %v3702_v45, %v3677_v39  ;;  %v3708_v50 = vshrl.u32 %v3702_v45, 16  ;;  %v3703_v52 = vcombine.high %v3702_v45, %v6040_v42  ;;  %v3713_v56 = vshrl.u32 %v3678_v55, 16 }
 0x3df   : > { %5638 = vmatprep.mubr.msk.bf16.mxu0 %vm6034_vm1, %v6033_v3 }
 0x3e0   : > { %v3720_v51 = vsel %vm2118_vm3, %v3706_v48, 0  ;;  %v3709_v57 = vpack.i.b16 %v3708_v50, %v3707_v49  ;;  %v3712_v59 = vpack.i.b16 %v3703_v52, %v3678_v55  ;;  %v3714_v61 = vshrl.u32 %v3703_v52, 16 }
 0x3e1   : > { %5631 = vmatpush3.bf16.msra.mxu1 %v3720_v51 }
 0x3e2   : > { %v3766_v60 = vsel %vm2118_vm3, %v3709_v57, 0  ;;  %5642 = vmatprep.subr.bf16.mxu1 %v6033_v3  ;;  %v3715_v1 = vpack.i.b16 %v3714_v61, %v3713_v56  ;;  %v3812_v2 = vsel %vm2118_vm3, %v3712_v59, 0 }
 0x3e3   : > { %5637 = vmatpush3.bf16.msra.mxu0 %v3766_v60 }
 0x3e4   : > { %5633 = vmatmul.mubr.msk.bf16.vlgmr.msra.gmra.mxu1 %vm2114_vm4, %v3288_v62  ;;  %5648 = vmatprep.subr.bf16.mxu0 %v6033_v3  ;;  %v3858_v8 = vsel %vm2118_vm3, %v3715_v1, 0 }
 0x3e5   : > { %5643 = vmatpush3.bf16.msra.mxu1 %v3812_v2  ;;  %5644 = vmatprep.mubr.msk.bf16.mxu1 %vm6034_vm1, %v6033_v3 }
 0x3e6   : > { %5639 = vmatmul.mubr.msk.bf16.vlgmr.msra.gmra.mxu0 %vm2114_vm4, %v3291_v4  ;;  %5654 = vmatprep.subr.bf16.mxu1 %v6033_v3 }
 0x3e7   : > { %5649 = vmatpush3.bf16.msra.mxu0 %v3858_v8  ;;  %5650 = vmatprep.mubr.msk.bf16.mxu0 %vm6034_vm1, %v6033_v3 }
 0x3e8   : > { %5660 = vmatprep.subr.bf16.mxu0 %v6033_v3 }
 0x3e9   : > { %v1473_v11 = vpop.permute.xlu1 %1472 }
 0x3ea   : > { %v1550_v14 = vcombine.low %v6416_v9, %v1473_v11  ;;  %v1551_v0 = vcombine.high %v6416_v9, %v1473_v11 }
 0x3ec   : > { %v1467_v16 = vpop.permute.xlu0 %1466  ;;  %5645 = vmatmul.mubr.msk.bf16.vlgmr.msra.gmra.mxu1 %vm2114_vm4, %v3294_v12  ;;  %v1558_v20 = vrot.slane %v1550_v14, %v6390_v35  ;;  %v1565_v24 = vrot.slane %v1551_v0, %v6390_v35 }
 0x3ed   : > { %v1479_v58 = vpop.permute.xlu1 %1478  ;;  %5656 = vmatprep.mubr.msk.bf16.mxu1 %vm6034_vm1, %v6033_v3 }
 0x3ee   : > { %v1566_v19 = vcombine.low %v1467_v16, %v1479_v58  ;;  %v1567_v6 = vcombine.high %v1467_v16, %v1479_v58  ;;  %5651 = vmatmul.mubr.msk.bf16.vlgmr.msra.gmra.mxu0 %vm2114_vm4, %v3297_v18 }
 0x3ef   : > { %5662 = vmatprep.mubr.msk.bf16.mxu0 %vm6034_vm1, %v6033_v3 }
 0x3f0   : > { %v1574_v21 = vrot.slane %v1566_v19, %v6390_v35  ;;  %v1581_v22 = vrot.slane %v1567_v6, %v6390_v35 }
 0x3f2   : > { %v1582_v25 = vcombine.low %v1558_v20, %v1574_v21  ;;  %v1583_v26 = vcombine.high %v1558_v20, %v1574_v21  ;;  %v1598_v9 = vcombine.low %v1565_v24, %v1581_v22  ;;  %v1599_v32 = vcombine.high %v1565_v24, %v1581_v22 }
 0x3f4   : > { %v1590_v13 = vrot.slane %v1582_v25, %v6393_v41  ;;  %v1597_v29 = vrot.slane %v1583_v26, %v6393_v41  ;;  %v1606_v30 = vrot.slane %v1598_v9, %v6393_v41  ;;  %v1613_v36 = vrot.slane %v1599_v32, %v6393_v41 }
 0x3f6   : > { %v1626_v27 = vpack.c.bf16 %v1590_v13, %v1590_v13  ;;  %v1614_v28 = vcombine.high %v1590_v13, %v6033_v3  ;;  %v1628_v33 = vpack.c.bf16 %v1597_v29, %v1597_v29  ;;  %v1615_v23 = vcombine.high %v1597_v29, %v6033_v3 }
 0x3f7   : > { %v1630_v34 = vpack.c.bf16 %v1606_v30, %v1606_v30  ;;  %v1616_v38 = vcombine.high %v1606_v30, %v6033_v3  ;;  %v1632_v39 = vpack.c.bf16 %v1613_v36, %v1613_v36  ;;  %v1617_v43 = vcombine.high %v1613_v36, %v6033_v3 }
 0x3f8   : > { %3953 = vxpose.xlu0.c.b16.start.end [1/1] (short) (narrow) %v1626_v27, 16  ;;  %v1627_v15 = vpack.c.bf16 %v1614_v28, %v1614_v28  ;;  %v1629_v37 = vpack.c.bf16 %v1615_v23, %v1615_v23 }
 0x3f9   : > { %v1631_v40 = vpack.c.bf16 %v1616_v38, %v1616_v38  ;;  %v1633_v44 = vpack.c.bf16 %v1617_v43, %v1617_v43 }
 0x3fa   : > { %3969 = vxpose.xlu1.c.b16.start.end [1/1] (short) (narrow) %v1627_v15, 16  ;;  %v916_v15 = vld [vmem:[%s6960_s4 + $0x1] sm:$0x1] }
 0x3fb   : > { %vm3904_vm8 = vcmp.eq.bf16.partialorder %v916_v15, 0 }
 0x3fc   : > { %3985 = vxpose.xlu0.c.b16.start.end [1/1] (short) (narrow) %v1628_v33, 16 }
 0x3fe   : > { %4017 = vxpose.xlu1.c.b16.start.end [1/1] (short) (narrow) %v1630_v34, 16 }
 0x400   : > { %4001 = vxpose.xlu0.c.b16.start.end [1/1] (short) (narrow) %v1629_v37, 16  ;;  %v3905_v37 = vsel %vm3904_vm8, 65537, %v6040_v42 }
 0x402   : > { %4049 = vxpose.xlu1.c.b16.start.end [1/1] (short) (narrow) %v1632_v39, 16 }
 0x404   : > { %4033 = vxpose.xlu0.c.b16.start.end [1/1] (short) (narrow) %v1631_v40, 16 }
 0x408   : > { %4065 = vxpose.xlu0.c.b16.start.end [1/1] (short) (narrow) %v1633_v44, 16  ;;  %v3906_v44 = vunpack.c.l.b16 %v3905_v37 }
 0x40a   : > { %vm3907_vm9 = vcmp.ne.s32.totalorder %v3906_v44, 0 }
 0x45a   : > { %v3961_v45 = vpop.trf.xlu0 }
 0x45c   : > { %v3977_v46 = vpop.trf.xlu1 }
 0x45e   : > { %v3993_v55 = vpop.trf.xlu0 }
 0x460   : > { %v4025_v47 = vpop.trf.xlu1 }
 0x461   : > { %v4081_v50 = vcombine.low %v3961_v45, %v4025_v47 }
 0x462   : > { %v4009_v48 = vpop.trf.xlu0 }
 0x463   : > { %v4088_v51 = vrot.slane %v4081_v50, %v6390_v35  ;;  %v3908_v50 = vsel %vm3907_vm9, 1, %v6040_v42 }
 0x464   : > { %v4057_v49 = vpop.trf.xlu1 }
 0x465   : > { %v4089_v52 = vcombine.low %v3993_v55, %v4057_v49 }
 0x466   : > { %v4041_v53 = vpop.trf.xlu0 }
 0x467   : > { %v4096_v56 = vrot.slane %v4089_v52, %v6390_v35  ;;  %v4115_v57 = vcombine.low %v3977_v46, %v4041_v53 }
 0x469   : > { %v4097_v61 = vcombine.low %v4088_v51, %v4096_v56  ;;  %v4122_v62 = vrot.slane %v4115_v57, %v6390_v35  ;;  %v4098_v1 = vcombine.high %v4088_v51, %v4096_v56  ;;  %v3912_v56 = vrot.slane %v3908_v50, %v2311_v7 }
 0x46a   : > { %v4073_v59 = vpop.trf.xlu0 }
 0x46b   : > { %v4123_v60 = vcombine.low %v4009_v48, %v4073_v59  ;;  %v4105_v5 = vrot.slane %v4097_v61, %v6393_v41  ;;  %v4112_v54 = vrot.slane %v4098_v1, %v6393_v41  ;;  %vm3913_vm10 = vcmp.eq.s32.totalorder %v3912_v56, 1 }
 0x46d   : > { %v4130_v63 = vrot.slane %v4123_v60, %v6390_v35  ;;  %v4153_v11 = vshrl.u32 %v4105_v5, 16  ;;  %v4169_v0 = vshrl.u32 %v4112_v54, 16  ;;  %v4113_v19 = vcombine.high %v4105_v5, %v6040_v42 }
 0x46e   : > { %v4114_v25 = vcombine.high %v4112_v54, %v6040_v42 }
 0x46f   : > { %v4131_v2 = vcombine.low %v4122_v62, %v4130_v63  ;;  %v4132_v4 = vcombine.high %v4122_v62, %v4130_v63  ;;  %v4161_v24 = vshrl.u32 %v4113_v19, 16 }
 0x470   : > { %v4177_v27 = vshrl.u32 %v4114_v25, 16 }
 0x471   : > { %v4139_v8 = vrot.slane %v4131_v2, %v6393_v41  ;;  %v4146_v17 = vrot.slane %v4132_v4, %v6393_v41 }
 0x473   : > { %v4151_v10 = vpack.i.b16 %v4139_v8, %v4105_v5  ;;  %v4154_v12 = vshrl.u32 %v4139_v8, 16  ;;  %v4170_v16 = vshrl.u32 %v4146_v17, 16  ;;  %v4147_v18 = vcombine.high %v4139_v8, %v6040_v42 }
 0x474   : > { %v4167_v58 = vpack.i.b16 %v4146_v17, %v4112_v54  ;;  %v4148_v21 = vcombine.high %v4146_v17, %v6040_v42 }
 0x475   : > { %4181 = vxpose.xlu1.c.b16.start.end [1/1] (short) (narrow) %v4151_v10, 16  ;;  %v4155_v14 = vpack.i.b16 %v4154_v12, %v4153_v11  ;;  %v4171_v6 = vpack.i.b16 %v4170_v16, %v4169_v0  ;;  %v4162_v20 = vshrl.u32 %v4147_v18, 16  ;;  %v4159_v22 = vpack.i.b16 %v4147_v18, %v4113_v19 }
 0x476   : > { %v4178_v13 = vshrl.u32 %v4148_v21, 16  ;;  %v4175_v9 = vpack.i.b16 %v4148_v21, %v4114_v25 }
 0x477   : > { %4197 = vxpose.xlu0.c.b16.start.end [1/1] (short) (narrow) %v4155_v14, 16  ;;  %v4163_v26 = vpack.i.b16 %v4162_v20, %v4161_v24 }
 0x478   : > { %v4179_v28 = vpack.i.b16 %v4178_v13, %v4177_v27 }
 0x479   : > { %4245 = vxpose.xlu1.c.b16.start.end [1/1] (short) (narrow) %v4167_v58, 16 }
 0x47b   : > { %4261 = vxpose.xlu0.c.b16.start.end [1/1] (short) (narrow) %v4171_v6, 16 }
 0x47d   : > { %4213 = vxpose.xlu1.c.b16.start.end [1/1] (short) (narrow) %v4159_v22, 16 }
 0x47f   : > { %4229 = vxpose.xlu0.c.b16.start.end [1/1] (short) (narrow) %v4163_v26, 16 }
 0x481   : > { %4277 = vxpose.xlu1.c.b16.start.end [1/1] (short) (narrow) %v4175_v9, 16 }
 0x483   : > { %4293 = vxpose.xlu0.c.b16.start.end [1/1] (short) (narrow) %v4179_v28, 16 }
 0x494   : > { %v2811_v29 = vpop.f32.mrf.mxu1 }
 0x495   : > { %2955 = vxpose.xlu1.b32.start.end [1/1] (short) (narrow) %v2811_v29, 8 }
 0x496   : > { %v5610_v30 = vpop.f32.mrf.mxu1  ;;  %v2857_v32 = vpop.f32.mrf.mxu0 }
 0x497   : > { %2987 = vxpose.xlu0.b32.start.end [1/1] (short) (narrow) %v2857_v32, 8 }
 0x498   : > { %v2814_v33 = vpop.f32.mrf.mxu1  ;;  %v5616_v23 = vpop.f32.mrf.mxu0 }
 0x49a   : > { %v5611_v34 = vpop.f32.mrf.mxu1  ;;  %v2860_v36 = vpop.f32.mrf.mxu0 }
 0x49c   : > { %v5617_v38 = vpop.f32.mrf.mxu0  ;;  %v2903_v39 = vpop.f32.mrf.mxu1 }
 0x49d   : > { %3019 = vxpose.xlu0.b32.start.end [1/1] (short) (narrow) %v2903_v39, 8 }
 0x49e   : > { %v5622_v40 = vpop.f32.mrf.mxu1  ;;  %v2949_v43 = vpop.f32.mrf.mxu0 }
 0x49f   : > { %3051 = vxpose.xlu1.b32.start.end [1/1] (short) (narrow) %v2949_v43, 8 }
 0x4a0   : > { %v2906_v45 = vpop.f32.mrf.mxu1  ;;  %v5628_v46 = vpop.f32.mrf.mxu0 }
 0x4a2   : > { %v5623_v55 = vpop.f32.mrf.mxu1  ;;  %v2952_v47 = vpop.f32.mrf.mxu0 }
 0x4a4   : > { %v5629_v48 = vpop.f32.mrf.mxu0  ;;  %v3756_v49 = vpop.f32.mrf.mxu1 }
 0x4a5   : > { %v3900_v62 = vmul.f32 0.35355338, %v3756_v49 }
 0x4a6   : > { %v5634_v52 = vpop.f32.mrf.mxu1  ;;  %v3802_v53 = vpop.f32.mrf.mxu0 }
 0x4a7   : > { %v3901_v59 = vmul.f32 0.35355338, %v3802_v53  ;;  %v3914_v17 = vsel %vm3913_vm10, -1e+10, %v3900_v62 }
 0x4a8   : > { %v3759_v51 = vpop.f32.mrf.mxu1  ;;  %v5640_v57 = vpop.f32.mrf.mxu0  ;;  %v3918_v14 = vsel %vm2114_vm4, %v3914_v17, -inf }
 0x4a9   : > { %v3915_v2 = vsel %vm3913_vm10, -1e+10, %v3901_v59 }
 0x4aa   : > { %v5635_v61 = vpop.f32.mrf.mxu1  ;;  %v3805_v60 = vpop.f32.mrf.mxu0  ;;  %v3919_v12 = vsel %vm2114_vm4, %v3915_v2, -inf }
 0x4ab   : > { %v3922_v19 = vmax.f32 %v3918_v14, %v3919_v12 }
 0x4ac   : > { %v5641_v63 = vpop.f32.mrf.mxu0  ;;  %v3848_v1 = vpop.f32.mrf.mxu1 }
 0x4ad   : > { %v3902_v4 = vmul.f32 0.35355338, %v3848_v1 }
 0x4ae   : > { %v5646_v5 = vpop.f32.mrf.mxu1  ;;  %v3894_v8 = vpop.f32.mrf.mxu0 }
 0x4af   : > { %v3916_v10 = vsel %vm3913_vm10, -1e+10, %v3902_v4  ;;  %v3903_v11 = vmul.f32 0.35355338, %v3894_v8 }
 0x4b0   : > { %v3851_v31 = vpop.f32.mrf.mxu1  ;;  %v5652_v7 = vpop.f32.mrf.mxu0  ;;  %v3920_v16 = vsel %vm2114_vm4, %v3916_v10, -inf }
 0x4b1   : > { %v3917_v54 = vsel %vm3913_vm10, -1e+10, %v3903_v11 }
 0x4b2   : > { %v3921_v18 = vsel %vm2114_vm4, %v3917_v54, -inf  ;;  %v5647_v58 = vpop.f32.mrf.mxu1  ;;  %v3897_v0 = vpop.f32.mrf.mxu0 }
 0x4b3   : > { %v3923_v6 = vmax.f32 %v3920_v16, %v3921_v18 }
 0x4b4   : > { %v5653_v20 = vpop.f32.mrf.mxu0 }
 0x4b5   : > { %v3924_v21 = vmax.f32 %v3922_v19, %v3923_v6 }
 0x4b7   : > { %v3925_v22 = vsub.f32 %v3914_v17, %v3924_v21  ;;  %v3926_v24 = vsub.f32 %v3915_v2, %v3924_v21  ;;  %v3927_v25 = vsub.f32 %v3916_v10, %v3924_v21  ;;  %v3928_v26 = vsub.f32 %v3917_v54, %v3924_v21 }
 0x4b9   : > { %v3929_v13 = vmul.f32 1.442695, %v3925_v22  ;;  %v3931_v9 = vmul.f32 1.442695, %v3926_v24  ;;  %v3933_v27 = vmul.f32 1.442695, %v3927_v25 }
 0x4ba   : > { %v3935_v28 = vmul.f32 1.442695, %v3928_v26 }
 0x4bb   : > { %5840 = vpow2.f32 %v3929_v13 }
 0x4bc   : > { %5842 = vpow2.f32 %v3931_v9 }
 0x4bd   : > { %5844 = vpow2.f32 %v3933_v27 }
 0x4be   : > { %5846 = vpow2.f32 %v3935_v28 }
 0x4c8   : > { %v5841_v29 = vpop.eup %5840 }
 0x4c9   : > { %v5843_v15 = vpop.eup %5842  ;;  %v3937_v30 = vsel %vm2114_vm4, %v5841_v29, 0.0 }
 0x4ca   : > { %v5845_v32 = vpop.eup %5844  ;;  %v3938_v33 = vsel %vm2114_vm4, %v5843_v15, 0.0 }
 0x4cb   : > { %v5847_v23 = vpop.eup %5846  ;;  %v3939_v34 = vadd.f32 %v3938_v33, %v3937_v30  ;;  %v3940_v36 = vsel %vm2114_vm4, %v5845_v32, 0.0 }
 0x4cc   : > { %v3942_v38 = vsel %vm2114_vm4, %v5847_v23, 0.0 }
 0x4cd   : > { %v3941_v37 = vadd.f32 %v3940_v36, %v3939_v34 }
 0x4cf   : > { %v3943_v39 = vadd.f32 %v3942_v38, %v3941_v37 }
 0x4d1   : > { %5848 = vrcp.f32 %v3943_v39 }
 0x4d7   : > { %v4189_v40 = vpop.trf.xlu1 }
 0x4d9   : > { %v4205_v43 = vpop.trf.xlu0 }
 0x4db   : > { %v4253_v44 = vpop.trf.xlu1 }
 0x4dc   : > { %v4309_v53 = vcombine.low %v4189_v40, %v4253_v44 }
 0x4dd   : > { %v4269_v45 = vpop.trf.xlu0 }
 0x4de   : > { %v5849_v46 = vpop.eup %5848  ;;  %v4334_v59 = vcombine.low %v4205_v43, %v4269_v45  ;;  %v4316_v62 = vrot.slane %v4309_v53, %v6390_v35 }
 0x4df   : > { %v4221_v55 = vpop.trf.xlu1  ;;  %v3945_v47 = vmul.f32 %v5849_v46, %v5841_v29  ;;  %v3946_v48 = vmul.f32 %v5849_v46, %v5843_v15  ;;  %v3947_v8 = vmul.f32 %v5849_v46, %v5845_v32  ;;  %v3948_v11 = vmul.f32 %v5849_v46, %v5847_v23 }
 0x4e0   : > { %v4341_v2 = vrot.slane %v4334_v59, %v6390_v35 }
 0x4e1   : > { %v4237_v49 = vpop.trf.xlu0  ;;  %v3949_v50 = vpack.c.bf16 %v3945_v47, %v3945_v47  ;;  %v3950_v52 = vpack.c.bf16 %v3946_v48, %v3946_v48  ;;  %v3951_v31 = vpack.c.bf16 %v3947_v8, %v3947_v8  ;;  %v3952_v16 = vpack.c.bf16 %v3948_v11, %v3948_v11 }
 0x4e3   : > { %v4285_v56 = vpop.trf.xlu1  ;;  %v4375_v51 = vsel %vm2114_vm4, %v3949_v50, 0  ;;  %v4421_v57 = vsel %vm2114_vm4, %v3950_v52, 0  ;;  %v4467_v58 = vsel %vm2114_vm4, %v3951_v31, 0  ;;  %v4513_v6 = vsel %vm2114_vm4, %v3952_v16, 0 }
 0x4e4   : > { %v4317_v61 = vcombine.low %v4221_v55, %v4285_v56  ;;  %5655 = vmatpush3.bf16.xpose.msra.mxu1 %v4375_v51  ;;  %5661 = vmatpush3.bf16.xpose.msra.mxu0 %v4421_v57 }
 0x4e5   : > { %v4301_v60 = vpop.trf.xlu0  ;;  %5666 = vmatprep.subr.bf16.mxu1 %v6033_v3  ;;  %5672 = vmatprep.subr.bf16.mxu0 %v6033_v3 }
 0x4e6   : > { %v4324_v63 = vrot.slane %v4317_v61, %v6390_v35  ;;  %v4342_v1 = vcombine.low %v4237_v49, %v4301_v60 }
 0x4e8   : > { %v4325_v4 = vcombine.low %v4316_v62, %v4324_v63  ;;  %v4349_v5 = vrot.slane %v4342_v1, %v6390_v35 }
 0x4ea   : > { %v4332_v17 = vrot.slane %v4325_v4, %v6393_v41  ;;  %v4350_v10 = vcombine.low %v4341_v2, %v4349_v5 }
 0x4ec   : > { %v4357_v12 = vrot.slane %v4350_v10, %v6393_v41  ;;  %v4362_v7 = vshrl.u32 %v4332_v17, 16  ;;  %v4333_v19 = vcombine.high %v4332_v17, %v6040_v42 }
 0x4ee   : > { %v4361_v54 = vpack.i.b16 %v4357_v12, %v4332_v17  ;;  %v4363_v14 = vshrl.u32 %v4357_v12, 16  ;;  %v4358_v18 = vcombine.high %v4357_v12, %v6040_v42  ;;  %v4368_v21 = vshrl.u32 %v4333_v19, 16 }
 0x4f0   : > { %5657 = vmatmul.mubr.msk.bf16.vlgmr.msra.gmra.mxu1 %vm2114_vm4, %v4361_v54  ;;  %v4364_v0 = vpack.i.b16 %v4363_v14, %v4362_v7  ;;  %v4369_v20 = vshrl.u32 %v4358_v18, 16  ;;  %v4367_v22 = vpack.i.b16 %v4358_v18, %v4333_v19 }
 0x4f1   : > { %5667 = vmatpush3.bf16.xpose.msra.mxu1 %v4467_v58  ;;  %5668 = vmatprep.mubr.msk.bf16.mxu1 %vm6034_vm1, %v6033_v3 }
 0x4f2   : > { %5663 = vmatmul.mubr.msk.bf16.vlgmr.msra.gmra.mxu0 %vm2114_vm4, %v4364_v0  ;;  %5678 = vmatprep.subr.bf16.mxu1 %v6033_v3  ;;  %v4370_v24 = vpack.i.b16 %v4369_v20, %v4368_v21 }
 0x4f3   : > { %5673 = vmatpush3.bf16.xpose.msra.mxu0 %v4513_v6  ;;  %5674 = vmatprep.mubr.msk.bf16.mxu0 %vm6034_vm1, %v6033_v3 }
 0x4f4   : > { %5686 = vmatprep.subr.bf16.mxu0 %v6033_v3 }
 0x4f8   : > { %5669 = vmatmul.mubr.msk.bf16.vlgmr.msra.gmra.mxu1 %vm2114_vm4, %v4367_v22 }
 0x4f9   : > { %5682 = vmatprep.mubr.msk.bf16.mxu1 %vm6034_vm1, %v6033_v3 }
 0x4fa   : > { %5675 = vmatmul.mubr.msk.bf16.vlgmr.msra.gmra.mxu0 %vm2114_vm4, %v4370_v24 }
 0x4fb   : > { %5690 = vmatprep.mubr.msk.bf16.mxu0 %vm6034_vm1, %v6033_v3 }
 0x511   : > { %v2971_v42 = vpop.trf.xlu1 }
 0x513   : > { %v3003_v25 = vpop.trf.xlu0 }
 0x519   : > { %v3035_v26 = vpop.trf.xlu0 }
 0x51a   : > { %v3083_v9 = vcombine.low %v2971_v42, %v3035_v26  ;;  %v3084_v27 = vcombine.high %v2971_v42, %v3035_v26 }
 0x51b   : > { %v3067_v13 = vpop.trf.xlu1 }
 0x51c   : > { %v3099_v28 = vcombine.low %v3003_v25, %v3067_v13  ;;  %v3100_v29 = vcombine.high %v3003_v25, %v3067_v13  ;;  %v3091_v15 = vrot.slane %v3083_v9, %v6390_v35  ;;  %v3098_v30 = vrot.slane %v3084_v27, %v6390_v35 }
 0x51e   : > { %v3107_v32 = vrot.slane %v3099_v28, %v6390_v35  ;;  %v3114_v33 = vrot.slane %v3100_v29, %v6390_v35 }
 0x520   : > { %v3115_v23 = vcombine.low %v3091_v15, %v3107_v32  ;;  %v3116_v34 = vcombine.high %v3091_v15, %v3107_v32  ;;  %v3131_v36 = vcombine.low %v3098_v30, %v3114_v33  ;;  %v3132_v37 = vcombine.high %v3098_v30, %v3114_v33 }
 0x522   : > { %v3123_v39 = vrot.slane %v3115_v23, %v6393_v41  ;;  %v3130_v40 = vrot.slane %v3116_v34, %v6393_v41  ;;  %v3139_v43 = vrot.slane %v3131_v36, %v6393_v41  ;;  %v3146_v44 = vrot.slane %v3132_v37, %v6393_v41  ;;  %v5822_v36 = vld [vmem:[%s6961_s12 + $0x8] sm:$0xff]  }
 0x523   : > { %5679 = vmatpush3.bf16.msra.mxu1 %v5822_v36 }
 0x524   : > { %v3151_v48 = vcombine.low %v3123_v39, %v3130_v40  ;;  %v5461_v49 = vcombine.high %v3123_v39, %v3130_v40  ;;  %v3167_v50 = vcombine.low %v3139_v43, %v3146_v44  ;;  %v5462_v52 = vcombine.high %v3139_v43, %v3146_v44  ;;  %5680 = vmatprep.subr.bf16.mxu1 %v6033_v3 }
 0x526   : > { %v3158_v59 = vrot.slane %v3151_v48, %v6390_v35  ;;  %v3166_v61 = vrot.slane %v5461_v49, %v6390_v35  ;;  %v3174_v60 = vrot.slane %v3167_v50, %v6390_v35  ;;  %v3182_v62 = vrot.slane %v5462_v52, %v6390_v35 }
 0x528   : > { %v3183_v5 = vcombine.low %v3158_v59, %v3166_v61  ;;  %v3199_v8 = vcombine.low %v3174_v60, %v3182_v62  ;;  %v3184_v15 = vcombine.high %v3158_v59, %v3166_v61  ;;  %v3200_v30 = vcombine.high %v3174_v60, %v3182_v62 }
 0x52a   : > { %v6759_v11 = vrot.slane %v3183_v5, %v6393_v41  ;;  %v6762_v12 = vrot.slane %v3199_v8, %v6393_v41  ;;  %v3198_v43 = vrot.slane %v3184_v15, %v6393_v41  ;;  %v3214_v44 = vrot.slane %v3200_v30, %v6393_v41 }
 0x52c   : > { %v3215_v7 = vcombine.low %v6759_v11, %v6762_v12 }
 0x5b0   : > { %v4411_v38 = vpop.f32.mrf.mxu1 }
 0x5b1   : > { %4555 = vxpose.xlu0.b32.start.end [1/1] (short) (narrow) %v4411_v38, 8 }
 0x5b2   : > { %v5658_v45 = vpop.f32.mrf.mxu1  ;;  %v4457_v46 = vpop.f32.mrf.mxu0 }
 0x5b3   : > { %4587 = vxpose.xlu1.b32.start.end [1/1] (short) (narrow) %v4457_v46, 8 }
 0x5b4   : > { %v4414_v55 = vpop.f32.mrf.mxu1  ;;  %v5664_v47 = vpop.f32.mrf.mxu0 }
 0x5b6   : > { %v5659_v53 = vpop.f32.mrf.mxu1  ;;  %v4460_v56 = vpop.f32.mrf.mxu0 }
 0x5b7   : > { %v3217_v53 = vcombine.low %v3198_v43, %v3214_v44 }
 0x5b8   : > { %v5665_v51 = vpop.f32.mrf.mxu0  ;;  %v4503_v57 = vpop.f32.mrf.mxu1 }
 0x5b9   : > { %4619 = vxpose.xlu0.b32.start.end [1/1] (short) (narrow) %v4503_v57, 8  ;;  %v3216_v51 = vcombine.high %v6759_v11, %v6762_v12  ;;  %v5477_v11 = vld [vmem:[%s6963_s27] ss:$0 sm:$0xff] }
 0x5ba   : > { %v5670_v63 = vpop.f32.mrf.mxu1  ;;  %v4549_v1 = vpop.f32.mrf.mxu0 }
 0x5bb   : > { %4651 = vxpose.xlu1.b32.start.end [1/1] (short) (narrow) %v4549_v1, 8 }
 0x5bc   : > { %v4506_v2 = vpop.f32.mrf.mxu1  ;;  %v5676_v4 = vpop.f32.mrf.mxu0 }
 0x5be   : > { %v5671_v17 = vpop.f32.mrf.mxu1  ;;  %v4552_v10 = vpop.f32.mrf.mxu0 }
 0x5c0   : > { %v5677_v31 = vpop.f32.mrf.mxu0 }
 0x62d   : > { %v4571_v54 = vpop.trf.xlu0 }
 0x62f   : > { %v4603_v14 = vpop.trf.xlu1 }
 0x635   : > { %v4635_v16 = vpop.trf.xlu0 }
 0x636   : > { %v4683_v18 = vcombine.low %v4571_v54, %v4635_v16  ;;  %v4684_v58 = vcombine.high %v4571_v54, %v4635_v16 }
 0x637   : > { %v4667_v0 = vpop.trf.xlu1 }
 0x638   : > { %v4699_v19 = vcombine.low %v4603_v14, %v4667_v0  ;;  %v4700_v6 = vcombine.high %v4603_v14, %v4667_v0  ;;  %v4691_v20 = vrot.slane %v4683_v18, %v6390_v35  ;;  %v4698_v21 = vrot.slane %v4684_v58, %v6390_v35 }
 0x63a   : > { %v4707_v22 = vrot.slane %v4699_v19, %v6390_v35  ;;  %v4714_v24 = vrot.slane %v4700_v6, %v6390_v35 }
 0x63c   : > { %v4715_v42 = vcombine.low %v4691_v20, %v4707_v22  ;;  %v4716_v25 = vcombine.high %v4691_v20, %v4707_v22  ;;  %v4731_v26 = vcombine.low %v4698_v21, %v4714_v24  ;;  %v4732_v13 = vcombine.high %v4698_v21, %v4714_v24  ;;  %v5858_v21 = vld [vmem:[#allocation2] sm:$0xff] }
 0x63e   : > { %v4723_v9 = vrot.slane %v4715_v42, %v6393_v41  ;;  %v4730_v27 = vrot.slane %v4716_v25, %v6393_v41  ;;  %v4739_v28 = vrot.slane %v4731_v26, %v6393_v41  ;;  %v4746_v29 = vrot.slane %v4732_v13, %v6393_v41  ;;  %v5859_v13 = vld [vmem:[#allocation2 + $0x8] sm:$0xff] }
 0x640   : > { %v4751_v32 = vcombine.low %v4723_v9, %v4730_v27  ;;  %v5475_v33 = vcombine.high %v4723_v9, %v4730_v27  ;;  %v4767_v23 = vcombine.low %v4739_v28, %v4746_v29  ;;  %v5476_v34 = vcombine.high %v4739_v28, %v4746_v29 }
 0x642   : > { %v4758_v37 = vrot.slane %v4751_v32, %v6390_v35  ;;  %v4766_v38 = vrot.slane %v5475_v33, %v6390_v35  ;;  %v4774_v39 = vrot.slane %v4767_v23, %v6390_v35  ;;  %v4782_v40 = vrot.slane %v5476_v34, %v6390_v35  ;;  %v5823_v35 = vld [vmem:[%s6962_s22] sm:$0xff]  }
 0x643   : > { %5681 = vmatpush3.bf16.msra.mxu1 %v5823_v35 }
 0x644   : > { %v4784_v45 = vcombine.high %v4758_v37, %v4766_v38  ;;  %v4800_v46 = vcombine.high %v4774_v39, %v4782_v40  ;;  %v4783_v55 = vcombine.low %v4758_v37, %v4766_v38  ;;  %v4799_v47 = vcombine.low %v4774_v39, %v4782_v40  ;;  %5694 = vmatprep.subr.bf16.mxu1 %v6033_v3  ;;  %v5824_v38 = vld [vmem:[%s736_s24 + $0x8] sm:$0xff]   ;;  %v5825_v39 = vld [vmem:[%s736_s24] sm:$0xff]  }
 0x645   : > { %5687 = vmatpush3.bf16.msra.mxu0 %v5824_v38  ;;  %v5826_v40 = vld [vmem:[%s6329_s1 + $0x18] sm:$0xff]  }
 0x646   : > { %v4798_v48 = vrot.slane %v4784_v45, %v6393_v41  ;;  %v4814_v49 = vrot.slane %v4800_v46, %v6393_v41  ;;  %v4791_v50 = vrot.slane %v4783_v55, %v6393_v41  ;;  %v4807_v52 = vrot.slane %v4799_v47, %v6393_v41  ;;  %5688 = vmatprep.subr.bf16.mxu0 %v6033_v3 }
 0x647   : > { %v3218_v41 = vcombine.high %v3198_v43, %v3214_v44 }
 0x648   : > { %v4817_v56 = vcombine.low %v4798_v48, %v4814_v49  ;;  %v4816_v57 = vcombine.high %v4791_v50, %v4807_v52  ;;  %v4815_v59 = vcombine.low %v4791_v50, %v4807_v52  ;;  %v4818_v62 = vcombine.high %v4798_v48, %v4814_v49  ;;  %v5481_v50 = vld [vmem:[%s6965_s16] ss:$0 sm:$0xff] }
 0x649   : > { %5689 = vmatpush3.bf16.msra.mxu0 %v5825_v39 }
 0x64a   : > { %v5806_v61 = vpack.i.bf16 %v4817_v56, %v3217_v53  ;;  %v5801_v60 = vpack.i.bf16 %v4816_v57, %v3216_v51  ;;  %v5811_v63 = vpack.i.bf16 %v4818_v62, %v3218_v41  ;;  %v5482_v56 = vld [vmem:[%s6967_s0] ss:$0 sm:$0xff]  ;;  %v5828_v62 = vld [vmem:[%s6329_s1 + $0x8] sm:$0xff]  }
 0x64b   : > { %v5829_v41 = vld [vmem:[%s6329_s1] sm:$0xff]  }
 0x64c   : > { %5807 = vrot.lane.b32.xlu1 %v5806_v61, %s6041_s19  ;;  %5802 = vrot.lane.b32.xlu0 %v5801_v60, %s6042_s15  ;;  %v5827_v60 = vld [vmem:[%s6329_s1 + $0x10] sm:$0xff]  }
 0x650   : > { %5812 = vrot.lane.b32.xlu1 %v5811_v63, %s6043_s20  ;;  %v5483_v63 = vld [vmem:[%s884_s29] ss:$0 sm:$0xff] }
 0x6be   : > { %v5808_v1 = vpop.permute.xlu1 %5807  ;;  %v5803_v2 = vpop.permute.xlu0 %5802 }
 0x6bf   : > { %v5805_v4 = vunpack.i.h.bf16 %v5803_v2  ;;  %v5804_v5 = vunpack.i.l.bf16 %v5803_v2  ;;  %v5810_v8 = vunpack.i.h.bf16 %v5808_v1  ;;  %v5809_v17 = vunpack.i.l.bf16 %v5808_v1 }
 0x6c1   : > { %v3231_v10 = vsel %vm2114_vm4, %v3215_v7, %v5804_v5  ;;  %v4831_v31 = vsel %vm2114_vm4, %v4815_v59, %v5805_v4 }
 0x6c2   : > { %v5813_v54 = vpop.permute.xlu1 %5812  ;;  %v3233_v18 = vsel %vm3232_vm11, %v3231_v10, %v5809_v17  ;;  %v4832_v58 = vsel %vm3232_vm11, %v4831_v31, %v5810_v8 }
 0x6c3   : > { %v5815_v14 = vunpack.i.h.bf16 %v5813_v54  ;;  %v5814_v16 = vunpack.i.l.bf16 %v5813_v54 }
 0x6c5   : > { %v3235_v0 = vsel %vm3234_vm12, %v3233_v18, %v5814_v16  ;;  %v4833_v19 = vsel %vm3234_vm12, %v4832_v58, %v5815_v14 }
 0x6c6   : > { %v4834_v6 = vpack.c.bf16 %v4833_v19, %v3235_v0 }
 0x6c8   : > { %5683 = vmatmul.mubr.msk.bf16.vlgmr.msra.gmra.mxu1 %vm955_vm2, %v4834_v6 }
 0x6c9   : > { %5702 = vmatprep.mubr.msk.bf16.mxu1 %vm6034_vm1, %v6033_v3  ;;  %5695 = vmatpush3.bf16.msra.mxu1 %v5826_v40 }
 0x6ca   : > { %5696 = vmatprep.subr.bf16.mxu1 %v6033_v3 }
 0x6cd   : > { %5697 = vmatpush3.bf16.msra.mxu1 %v5827_v60 }
 0x6ce   : > { %5698 = vmatprep.subr.bf16.mxu1 %v6033_v3 }
 0x6d1   : > { %5699 = vmatpush3.bf16.msra.mxu1 %v5828_v62 }
 0x6d2   : > { %5700 = vmatprep.subr.bf16.mxu1 %v6033_v3  ;;  %v5487_v3 = vld [vmem:[%s892_s8] ss:$0 sm:$0xff] }
 0x6d5   : > { %5701 = vmatpush3.bf16.msra.mxu1 %v5829_v41 }
 0x788   : > { %v4890_v12 = vpop.f32.mrf.mxu1 }
 0x789   : > { %v4891_v7 = vadd.f32 %v5477_v11, %v4890_v12 }
 0x78a   : > { %v5684_v20 = vpop.f32.mrf.mxu1 }
 0x78b   : > { %v4897_v22 = vadd.f32 %v5858_v21, %v4891_v7 }
 0x78c   : > { %v4893_v24 = vpop.f32.mrf.mxu1 }
 0x78d   : > { %v4894_v42 = vadd.f32 %v5477_v11, %v4893_v24  ;;  %v4901_v25 = vsel %vm955_vm2, %v4897_v22, 0.0 }
 0x78e   : > { %4902 = vadd.xlane.f32.xlu1 %v4901_v25  ;;  %v5685_v26 = vpop.f32.mrf.mxu1 }
 0x78f   : > { %v4898_v9 = vadd.f32 %v5859_v13, %v4894_v42 }
 0x791   : > { %v4904_v27 = vsel %vm955_vm2, %v4898_v9, 0.0 }
 0x792   : > { %4905 = vadd.xlane.f32.xlu0 %v4904_v27 }
 0x817   : > { %v4903_v28 = vpop.xlane.xlu1 %4902 }
 0x818   : > { %v4908_v29 = vmul.f32 0.03125, %v4903_v28 }
 0x81a   : > { %v4910_v15 = vsub.f32 %v4897_v22, %v4908_v29 }
 0x81b   : > { %v4906_v30 = vpop.xlane.xlu0 %4905 }
 0x81c   : > { %v4909_v32 = vmul.f32 0.03125, %v4906_v30  ;;  %v4912_v33 = vmul.f32 %v4910_v15, %v4910_v15 }
 0x81e   : > { %v4911_v23 = vsub.f32 %v4898_v9, %v4909_v32  ;;  %v4914_v34 = vsel %vm955_vm2, %v4912_v33, 0.0 }
 0x81f   : > { %4915 = vadd.xlane.f32.xlu0 %v4914_v34  ;;  %v5493_v34 = vld [vmem:[%s895_s10] ss:$0 sm:$0xff] }
 0x820   : > { %v4913_v36 = vmul.f32 %v4911_v23, %v4911_v23 }
 0x822   : > { %v4917_v37 = vsel %vm955_vm2, %v4913_v36, 0.0 }
 0x823   : > { %4918 = vadd.xlane.f32.xlu1 %v4917_v37  ;;  %v5494_v37 = vld [vmem:[%s898_s11] ss:$0 sm:$0xff] }
 0x8a8   : > { %v4916_v43 = vpop.xlane.xlu0 %4915 }
 0x8a9   : > { %v4920_v44 = vmul.f32 0.03125, %v4916_v43 }
 0x8ab   : > { %v4922_v45 = vadd.f32 1e-05, %v4920_v44 }
 0x8ac   : > { %v4919_v46 = vpop.xlane.xlu1 %4918 }
 0x8ad   : > { %5850 = vrsqrt.f32 %v4922_v45  ;;  %v4921_v55 = vmul.f32 0.03125, %v4919_v46 }
 0x8af   : > { %v4923_v47 = vadd.f32 1e-05, %v4921_v55 }
 0x8b1   : > { %5852 = vrsqrt.f32 %v4923_v47 }
 0x8ba   : > { %v5851_v48 = vpop.eup %5850 }
 0x8bb   : > { %v4926_v49 = vmul.f32 %v5851_v48, %v4910_v15 }
 0x8bd   : > { %v4934_v53 = vmul.f32 %v5481_v50, %v4926_v49 }
 0x8be   : > { %v5853_v52 = vpop.eup %5852 }
 0x8bf   : > { %v4927_v35 = vmul.f32 %v5853_v52, %v4911_v23  ;;  %v4942_v57 = vadd.f32 %v5482_v56, %v4934_v53 }
 0x8c1   : > { %v4935_v51 = vmul.f32 %v5481_v50, %v4927_v35 }
 0x8c3   : > { %v4943_v59 = vadd.f32 %v5482_v56, %v4935_v51 }
 0x8c5   : > { %v4958_v61 = vpack.c.bf16 %v4943_v59, %v4942_v57 }
 0x8c7   : > { %5691 = vmatmul.mubr.msk.bf16.vlgmr.msra.gmra.mxu0 %vm955_vm2, %v4958_v61 }
 0x987   : > { %v5014_v1 = vpop.f32.mrf.mxu0 }
 0x988   : > { %v5015_v4 = vadd.f32 %v5483_v63, %v5014_v1 }
 0x989   : > { %v5692_v2 = vpop.f32.mrf.mxu0 }
 0x98a   : > { %v5021_v10 = vmax.f32 %v5015_v4, 0.0 }
 0x98b   : > { %v5017_v5 = vpop.f32.mrf.mxu0 }
 0x98c   : > { %v5018_v8 = vadd.f32 %v5483_v63, %v5017_v5 }
 0x98d   : > { %v5693_v17 = vpop.f32.mrf.mxu0 }
 0x98e   : > { %v5022_v31 = vmax.f32 %v5018_v8, 0.0 }
 0x990   : > { %v5023_v54 = vpack.c.bf16 %v5022_v31, %v5021_v10 }
 0x992   : > { %5703 = vmatmul.mubr.msk.bf16.vlgmr.msra.gmra.mxu1 %vm5054_vm13, %v5023_v54 }
 0xa52   : > { %v5092_v14 = vpop.f32.mrf.mxu1 }
 0xa53   : > { %v5093_v16 = vadd.f32 %v5487_v3, %v5092_v14 }
 0xa54   : > { %v5704_v18 = vpop.f32.mrf.mxu1 }
 0xa55   : > { %v5099_v58 = vadd.f32 %v5093_v16, %v4942_v57 }
 0xa56   : > { %v5095_v0 = vpop.f32.mrf.mxu1 }
 0xa57   : > { %v5096_v19 = vadd.f32 %v5487_v3, %v5095_v0  ;;  %v5103_v6 = vsel %vm955_vm2, %v5099_v58, 0.0 }
 0xa58   : > { %5104 = vadd.xlane.f32.xlu0 %v5103_v6  ;;  %v5705_v11 = vpop.f32.mrf.mxu1 }
 0xa59   : > { %v5100_v12 = vadd.f32 %v5096_v19, %v4943_v59 }
 0xa5b   : > { %v5106_v7 = vsel %vm955_vm2, %v5100_v12, 0.0 }
 0xa5c   : > { %5107 = vadd.xlane.f32.xlu1 %v5106_v7 }
 0xae1   : > { %v5105_v20 = vpop.xlane.xlu0 %5104 }
 0xae2   : > { %v5109_v21 = vmul.f32 0.03125, %v5105_v20 }
 0xae4   : > { %v5111_v22 = vsub.f32 %v5099_v58, %v5109_v21 }
 0xae5   : > { %v5108_v24 = vpop.xlane.xlu1 %5107 }
 0xae6   : > { %v5110_v42 = vmul.f32 0.03125, %v5108_v24  ;;  %v5113_v25 = vmul.f32 %v5111_v22, %v5111_v22 }
 0xae8   : > { %v5112_v26 = vsub.f32 %v5100_v12, %v5110_v42  ;;  %v5115_v13 = vsel %vm955_vm2, %v5113_v25, 0.0 }
 0xae9   : > { %5116 = vadd.xlane.f32.xlu0 %v5115_v13 }
 0xaea   : > { %v5114_v9 = vmul.f32 %v5112_v26, %v5112_v26 }
 0xaec   : > { %v5118_v27 = vsel %vm955_vm2, %v5114_v9, 0.0 }
 0xaed   : > { %5119 = vadd.xlane.f32.xlu1 %v5118_v27 }
 0xb72   : > { %v5117_v28 = vpop.xlane.xlu0 %5116 }
 0xb73   : > { %v5121_v29 = vmul.f32 0.03125, %v5117_v28 }
 0xb75   : > { %v5123_v15 = vadd.f32 1e-05, %v5121_v29 }
 0xb76   : > { %v5120_v30 = vpop.xlane.xlu1 %5119 }
 0xb77   : > { %5854 = vrsqrt.f32 %v5123_v15  ;;  %v5122_v32 = vmul.f32 0.03125, %v5120_v30 }
 0xb79   : > { %v5124_v33 = vadd.f32 1e-05, %v5122_v32 }
 0xb7b   : > { %5856 = vrsqrt.f32 %v5124_v33 }
 0xb84   : > { %v5855_v23 = vpop.eup %5854 }
 0xb85   : > { %v5127_v36 = vmul.f32 %v5855_v23, %v5111_v22 }
 0xb87   : > { %v5135_v38 = vmul.f32 %v5493_v34, %v5127_v36 }
 0xb88   : > { %v5857_v39 = vpop.eup %5856 }
 0xb89   : > { %v5143_v40 = vadd.f32 %v5494_v37, %v5135_v38  ;;  %v5128_v43 = vmul.f32 %v5857_v39, %v5112_v26 }
 0xb8b   : > { %5145 = vst.msk [vmem:[#allocation2] sm:$0xff] %vm955_vm2, %v5143_v40  ;;  %v5136_v44 = vmul.f32 %v5493_v34, %v5128_v43  ;;  %5150 = sbr.rel (%p5495_p5) target bundleno = 2963 (0xb93), region = 112 }
 0xb8d   : > { %v5144_v45 = vadd.f32 %v5494_v37, %v5136_v44 }
 0xb8f   : > { %5146 = vst.msk [vmem:[#allocation2 + $0x8] sm:$0xff] %vm955_vm2, %v5144_v45 }
 0xb90   : > { %v5151_v46 = vpack.c.bf16 %v5143_v40, %v5143_v40  ;;  %vm5153_vm14 = vcmask 257024   ;;  %v5152_v55 = vpack.c.bf16 %v5144_v45, %v5144_v45 }
 0xb92   : > { %5154 = vst.msk [vmem:[#allocation9] sm:$0xf] %vm5153_vm14, %v5151_v46  ;;  %5155 = vst.msk [vmem:[#allocation9 + $0x4] sm:$0xf] %vm5153_vm14, %v5152_v55 }
 0xb93 PF: > { %s6971_s10 = sld [smem:[#allocation19_spill]]  ;;  %s6044_s11 = smov [#allocation9]  }
 0xb94   : > { %s5165_s23 = sshll.u32 %s6044_s11, 4  ;;  %s5166_s23 = int_to_ptr.vmem [resolvable:$true] %s5165_s23 }
 0xb95   : > { %s5942_s27 = scalar_lea.vmem %s5166_s23, 128  ;;  %p5949_p9 = scmp.lt.s32.totalorder %s5166_s23, %s5166_s23 }
 0xb96   : > { %p5943_p10 = scmp.ne.s32.totalorder %s5166_s23, %s5942_s27  ;;  %p5950_p11 = scmp.lt.s32.totalorder %s5942_s27, %s5942_s27 }
 0xb98   : > { %p5951_p12 = por %p5950_p11, %p5949_p9 }
 0xb99   : > { %p5732_p8 = scmp.eq.s32.totalorder %s6971_s10, 1 }
 0xb9b   : > { %p5944_p4 = pnand %p5943_p10, %p5732_p8 }
 0xb9d   : > { %p5945_p7 = pneg %p5944_p4 }
 0xb9f   : > { %p5952_p13 = pnand %p5951_p12, %p5945_p7 }
 0xba1   : > { %5955 = shalt.err (!%p5952_p13)
}
 0xba2   : > { %s6045_s30 = smov 64   ;;  %s6046_s18 = smov 4  }
 0xba3   : > { %s6972_s16 = sld [smem:[#allocation32_spill]] }
 0xba9   : > { %5715 = dma.vmem_to_hbm [thread:$0]  (%p5732_p8), %s5166_s23, 128, %s6972_s16, [#allocation5], %s6045_s30, %s6045_s30, %s6046_s18  }
 0xbaa   : > { %5999 = dma.done.wait (%p5732_p8), [#allocation5], 128  }
 0xbab   : > { %6001 = vsyncadd (%p5732_p8), [#allocation5], 4294967168 }
 0xbac PF: > { %s6973_s17 = sld [smem:[#allocation16_spill]] }
 0xbad   : > { %s6974_s27 = sld [smem:[#allocation13_spill]] }
 0xbae   : > { %s6975_s28 = sld [smem:[#allocation14_spill]] }
 0xbaf   : > { %s6976_s29 = sld [smem:[#allocation18_spill]] }
 0xbb0   : > { %s6977_s30 = sld [smem:[#allocation15_spill]] }
 0xbb1   : > { %s6978_s0 = sld [smem:[#allocation17_spill]] }
 0xbb2   : > { %s33_s19 = sadd.s32 1, %s6973_s17  }
 0xbb3   : > { %p30_p0 = scmp.ge.s32.totalorder %s33_s19, 4  }
 0xbb5   :  { %32 = sbr.rel (!%p30_p0) target bundleno = 20 (0x14), region = 200 }
 0xbba   :  { %5181 = vsyncpa [#allocation4], 1 }
 0xbbb   :  { %5183 = vsyncpa [#allocation4 + $0x1], 1 }
 0xbbc   :  { %5184 = vsyncpa [#allocation7], 1 }
 0xbbd   :  { %5186 = vsyncpa [#allocation7 + $0x1], 1 }
 0xbbe   :  { %5187 = vsyncpa [#allocation5], 1 }
 0xbbf   :  { %5189 = vsyncpa [#allocation5 + $0x1], 1 }

</bundles_post_ra>
